<compile_context>
chip_gen: v5e
topology: v5e:2x2
jax: 0.10.0
libtpu: 0.0.40
codegen_flags: <defaults>
</compile_context>

<pallas_src>
import functools

import jax
import jax.numpy as jnp
from jax import lax
from jax.experimental import pallas as pl
from jax.experimental.pallas import tpu as pltpu


def _round_up(n, m):
    return ((n + m - 1) // m) * m


def _row_offsets(input_size, hidden_size):
    """Static sublane row offsets inside the packed weight array.

    Every piece starts on an 8-sublane boundary so in-kernel loads are aligned.
    Order: wi0, wh0, wi1, wh1, b0, b1, fc1_w, fc1_b, fc2_w(row), fc2_b.
    """
    I, H = input_size, hidden_size
    r_wi0 = 0
    r_wh0 = r_wi0 + _round_up(I, 8)
    r_wi1 = r_wh0 + _round_up(H, 8)
    r_wh1 = r_wi1 + _round_up(H, 8)
    r_b0 = r_wh1 + _round_up(H, 8)
    r_b1 = r_b0 + 8
    r_w1 = r_b1 + 8
    r_bf1 = r_w1 + _round_up(H, 8)
    r_w2 = r_bf1 + 8
    r_bf2 = r_w2 + 8
    total = r_bf2 + 8
    return (r_wi0, r_wh0, r_wi1, r_wh1, r_b0, r_b1, r_w1, r_bf1, r_w2, r_bf2), total


def _lstm_kernel(x2d_ref,            # (T*Bp, I)  time-major, flattened, f32
                 w_ref,              # (R, Lp)    packed weights/biases, f32
                 out_ref,            # (Bp, 1)
                 *, T, Bp, H, I, rows):
    H4 = 4 * H
    (r_wi0, r_wh0, r_wi1, r_wh1, r_b0, r_b1, r_w1, r_bf1, r_w2, r_bf2) = rows

    # ---- Hoisted layer-0 input projection (off the recurrence critical path).
    # Kept f32: a single preamble matmul whose extra MXU passes are hidden.
    wi0 = w_ref[r_wi0:r_wi0 + I, :H4]
    b0 = w_ref[r_b0:r_b0 + 1, :H4]
    gx0 = jnp.dot(x2d_ref[...], wi0, preferred_element_type=jnp.float32) + b0

    # Recurrence weights resident in vregs, cast once to bf16 so each of the
    # 3*T serialized recurrence matmuls is a single MXU pass (f32 accumulate).
    wh0 = w_ref[r_wh0:r_wh0 + H, :H4].astype(jnp.bfloat16)
    wi1 = w_ref[r_wi1:r_wi1 + H, :H4].astype(jnp.bfloat16)
    wh1 = w_ref[r_wh1:r_wh1 + H, :H4].astype(jnp.bfloat16)
    # Hoisted bias broadcast for layer 1 (JAX does not CSE broadcast_in_dim).
    b1b = jnp.broadcast_to(w_ref[r_b1:r_b1 + 1, :H4], (Bp, H4))

    # PyTorch gate order [i, f, g, o]; the "g" slot [2H:3H) needs tanh.
    # Single EUP op per gate vreg: tanh(x) = 2*sigmoid(2x) - 1, applied via
    # precomputed {1,1,2,1} / {0,0,-1,0} lane vectors (VPU mul/add has slack).
    lane = lax.broadcasted_iota(jnp.int32, (Bp, H4), 1)
    g_slot = (lane >= 2 * H) & (lane < 3 * H)
    pre_m = jnp.where(g_slot, 2.0, 1.0)
    post_b = jnp.where(g_slot, -1.0, 0.0)

    def gates(g):
        s = jax.nn.sigmoid(g * pre_m)
        act = s * pre_m + post_b
        # TODO(synk): verify in the bundle dump that these static lane slices
        # don't each materialize an XLU rotate on the critical path.
        return (act[:, 0:H], act[:, H:2 * H],
                act[:, 2 * H:3 * H], act[:, 3 * H:4 * H])

    zf = jnp.zeros((Bp, H), jnp.float32)
    zb = jnp.zeros((Bp, H), jnp.bfloat16)
    c0, c1 = zf, zf
    h0_bf, h1_bf = zb, zb

    # Fully unrolled time loop (T is small and static): static sublane-aligned
    # slices into gx0, full scheduler visibility across steps.
    for t in range(T):
        # Both hidden-state projections depend only on step t-1 state, so their
        # MXU pushes can overlap each other / the surrounding gate math.
        g0 = gx0[t * Bp:(t + 1) * Bp, :] + jnp.dot(
            h0_bf, wh0, preferred_element_type=jnp.float32)
        gh1 = jnp.dot(h1_bf, wh1, preferred_element_type=jnp.float32) + b1b

        # ---- layer 0
        i0, f0, gg0, o0 = gates(g0)
        c0 = f0 * c0 + i0 * gg0
        h0 = o0 * jnp.tanh(c0)
        h0_bf = h0.astype(jnp.bfloat16)

        # ---- layer 1: only dot(h0_t, Wi1) is on the current step's chain.
        g1 = jnp.dot(h0_bf, wi1, preferred_element_type=jnp.float32) + gh1
        i1, f1, gg1, o1 = gates(g1)
        c1 = f1 * c1 + i1 * gg1
        h1 = o1 * jnp.tanh(c1)
        h1_bf = h1.astype(jnp.bfloat16)

    # FC head on the last layer-1 hidden state (dropout = identity in eval).
    # fc1 is zero-padded to Lp=128 lanes; fc2 weights are stored as a (1, Lp)
    # row and reduced over lanes, so the padding contributes exactly zero.
    w1 = w_ref[r_w1:r_w1 + H, :]
    bf1 = w_ref[r_bf1:r_bf1 + 1, :]
    w2row = w_ref[r_w2:r_w2 + 1, :]
    bf2 = w_ref[r_bf2:r_bf2 + 1, :][:, 0:1]

    y = jnp.maximum(
        jnp.dot(h1, w1, preferred_element_type=jnp.float32) + bf1, 0.0)
    out = jnp.sum(y * w2row, axis=1, keepdims=True) + bf2
    out_ref[...] = out.astype(out_ref.dtype)


def init_params(key, input_size, hidden_size):
    """Deterministic param init matching nn.LSTM / nn.Linear shapes."""
    H = hidden_size
    ks = jax.random.split(key, 12)
    u = lambda k, shape, bound: jax.random.uniform(
        k, shape, jnp.float32, minval=-bound, maxval=bound)
    bL = 1.0 / jnp.sqrt(H)
    # LSTM layer 0
    w_ih0 = u(ks[0], (4 * H, input_size), bL)
    w_hh0 = u(ks[1], (4 * H, H), bL)
    b_ih0 = u(ks[2], (4 * H,), bL)
    b_hh0 = u(ks[3], (4 * H,), bL)
    # LSTM layer 1
    w_ih1 = u(ks[4], (4 * H, H), bL)
    w_hh1 = u(ks[5], (4 * H, H), bL)
    b_ih1 = u(ks[6], (4 * H,), bL)
    b_hh1 = u(ks[7], (4 * H,), bL)
    # fc1: Linear(H, 25), fc2: Linear(25, 1)
    b1f = 1.0 / jnp.sqrt(H)
    fc1_w = u(ks[8], (25, H), b1f)
    fc1_b = u(ks[9], (25,), b1f)
    b2f = 1.0 / jnp.sqrt(25.0)
    fc2_w = u(ks[10], (1, 25), b2f)
    fc2_b = u(ks[11], (1,), b2f)
    return dict(w_ih0=w_ih0, w_hh0=w_hh0, b_ih0=b_ih0, b_hh0=b_hh0,
                w_ih1=w_ih1, w_hh1=w_hh1, b_ih1=b_ih1, b_hh1=b_hh1,
                fc1_w=fc1_w, fc1_b=fc1_b, fc2_w=fc2_w, fc2_b=fc2_b)


def prepare_params(params, *, input_size, hidden_size):
    """One-time layout prep: pack every weight/bias into a single (R, Lp) f32
    array (one kernel DMA). Transposes, bias folding, and fc-head padding are
    done here instead of on every forward call."""
    I, H = input_size, hidden_size
    H4 = 4 * H
    F1 = params["fc1_w"].shape[0]
    Lp = max(_round_up(H4, 128), 128)
    rows, total = _row_offsets(I, H)
    (r_wi0, r_wh0, r_wi1, r_wh1, r_b0, r_b1, r_w1, r_bf1, r_w2, r_bf2) = rows

    w = jnp.zeros((total, Lp), jnp.float32)

    def put(w, r, a):
        rr, cc = a.shape
        return w.at[r:r + rr, 0:cc].set(a.astype(jnp.float32))

    w = put(w, r_wi0, params["w_ih0"].T)                              # (I, 4H)
    w = put(w, r_wh0, params["w_hh0"].T)                              # (H, 4H)
    w = put(w, r_wi1, params["w_ih1"].T)                              # (H, 4H)
    w = put(w, r_wh1, params["w_hh1"].T)                              # (H, 4H)
    w = put(w, r_b0, (params["b_ih0"] + params["b_hh0"]).reshape(1, H4))
    w = put(w, r_b1, (params["b_ih1"] + params["b_hh1"]).reshape(1, H4))
    w = put(w, r_w1, params["fc1_w"].T)                               # (H, F1)
    w = put(w, r_bf1, params["fc1_b"].reshape(1, F1))
    w = put(w, r_w2, params["fc2_w"].reshape(1, F1))                  # row store
    w = put(w, r_bf2, params["fc2_b"].reshape(1, 1))
    return w


@functools.partial(jax.jit, static_argnames=("hidden_size",))
def lstm_model_forward(x, w_packed, *, hidden_size):
    """x: (B, T, I) float32, batch-first like PyTorch. Returns (B, 1)."""
    B, T, I = x.shape
    H = hidden_size
    Bp = _round_up(B, 8)
    rows, _ = _row_offsets(I, H)

    # Per-call glue only: pad batch to 8 sublanes, make x time-major & flatten
    # so the hoisted input projection is one (T*Bp, I) @ (I, 4H) matmul.
    x_p = jnp.pad(x, ((0, Bp - B), (0, 0), (0, 0)))
    x2d = jnp.transpose(x_p, (1, 0, 2)).reshape(T * Bp, I)

    # TODO(synk): if B/T scale up, add a batch-parallel grid axis ("parallel",
    # 2 TensorCores on v7x) and T-chunk the x2d stream with Buffered specs; at
    # these shapes everything fits in <100 KiB of VMEM so one grid step is best.
    out_p = pl.pallas_call(
        functools.partial(_lstm_kernel, T=T, Bp=Bp, H=H, I=I, rows=rows),
        out_shape=jax.ShapeDtypeStruct((Bp, 1), jnp.float32),
        grid=(1,),
        in_specs=[
            pl.BlockSpec(x2d.shape, lambda i: (0, 0)),
            pl.BlockSpec(w_packed.shape, lambda i: (0, 0)),
        ],
        out_specs=pl.BlockSpec((Bp, 1), lambda i: (0, 0)),
        compiler_params=pltpu.CompilerParams(
            dimension_semantics=("arbitrary",)),
    )(x2d, w_packed)

    return out_p[:B]


if __name__ == "__main__":
    # Small shapes consistent with the module: batch=4, seq=8, input=16, hidden=32.
    B, T, I, H = 4, 8, 16, 32
    key = jax.random.PRNGKey(0)
    kx, kp = jax.random.split(key)
    x = jax.random.normal(kx, (B, T, I), jnp.float32)
    params = init_params(kp, input_size=I, hidden_size=H)

    # One-time param packing (hoisted out of the per-call forward).
    w_packed = prepare_params(params, input_size=I, hidden_size=H)

    out = lstm_model_forward(x, w_packed, hidden_size=H)
    out = jax.block_until_ready(out)
    assert out.shape == (B, 1), out.shape
    print("KERNEL_OK")
</pallas_src>

<mosaic_0001>
module attributes {stable_mosaic.version = 11 : i64} {
  func.func @_lstm_kernel(%arg0: i32, %arg1: memref<64x16xf32, #tpu.memory_space<vmem>>, %arg2: memref<184x128xf32, #tpu.memory_space<vmem>>, %arg3: memref<8x1xf32, #tpu.memory_space<vmem>>) attributes {dimension_semantics = [#tpu.dimension_semantics<arbitrary>], iteration_bounds = array<i64: 1>, scalar_prefetch = 0 : i64, scratch_operands = 0 : i64, tpu.core_type = #tpu.core_type<tc>, window_params = [{pipeline_mode = #tpu.pipeline_mode<synchronous>, transform_indices = @transform_0, window_bounds = array<i64: 64, 16>}, {pipeline_mode = #tpu.pipeline_mode<synchronous>, transform_indices = @transform_1, window_bounds = array<i64: 184, 128>}, {pipeline_mode = #tpu.pipeline_mode<synchronous>, transform_indices = @transform_2, window_bounds = array<i64: 8, 1>}]} {
    %c0 = arith.constant 0 : index
    %c0_0 = arith.constant 0 : index
    %0 = vector.load %arg2[%c0, %c0_0] : memref<184x128xf32, #tpu.memory_space<vmem>>, vector<16x128xf32>
    %c112 = arith.constant 112 : index
    %c0_1 = arith.constant 0 : index
    %1 = vector.load %arg2[%c112, %c0_1] : memref<184x128xf32, #tpu.memory_space<vmem>>, vector<1x128xf32>
    %c0_2 = arith.constant 0 : index
    %c0_3 = arith.constant 0 : index
    %2 = vector.load %arg1[%c0_2, %c0_3] : memref<64x16xf32, #tpu.memory_space<vmem>>, vector<64x16xf32>
    %cst = arith.constant dense<0.000000e+00> : vector<64x128xf32>
    %3 = tpu.matmul %2, %0, %cst {dimension_numbers = #tpu.dot_dimension_numbers<[1], [0], [0], [1], [0, 0, 1, 1], [], []>} : vector<64x16xf32>, vector<16x128xf32>, vector<64x128xf32> -> vector<64x128xf32>
    %4 = vector.broadcast %1 : vector<1x128xf32> to vector<64x128xf32>
    %5 = arith.addf %3, %4 : vector<64x128xf32>
    %c16 = arith.constant 16 : index
    %c0_4 = arith.constant 0 : index
    %6 = vector.load %arg2[%c16, %c0_4] : memref<184x128xf32, #tpu.memory_space<vmem>>, vector<32x128xf32>
    %7 = arith.truncf %6 : vector<32x128xf32> to vector<32x128xbf16>
    %c48 = arith.constant 48 : index
    %c0_5 = arith.constant 0 : index
    %8 = vector.load %arg2[%c48, %c0_5] : memref<184x128xf32, #tpu.memory_space<vmem>>, vector<32x128xf32>
    %9 = arith.truncf %8 : vector<32x128xf32> to vector<32x128xbf16>
    %c80 = arith.constant 80 : index
    %c0_6 = arith.constant 0 : index
    %10 = vector.load %arg2[%c80, %c0_6] : memref<184x128xf32, #tpu.memory_space<vmem>>, vector<32x128xf32>
    %11 = arith.truncf %10 : vector<32x128xf32> to vector<32x128xbf16>
    %c120 = arith.constant 120 : index
    %c0_7 = arith.constant 0 : index
    %12 = vector.load %arg2[%c120, %c0_7] : memref<184x128xf32, #tpu.memory_space<vmem>>, vector<1x128xf32>
    %13 = vector.shape_cast %12 : vector<1x128xf32> to vector<1x128xf32>
    %14 = vector.broadcast %13 : vector<1x128xf32> to vector<8x128xf32>
    %15 = tpu.iota {dimensions = array<i32: 1>} : vector<8x128xi32>
    %c64_i32 = arith.constant 64 : i32
    %16 = vector.broadcast %c64_i32 : i32 to vector<8x128xi32>
    %17 = arith.cmpi sge, %15, %16 : vector<8x128xi32>
    %c96_i32 = arith.constant 96 : i32
    %18 = vector.broadcast %c96_i32 : i32 to vector<8x128xi32>
    %19 = arith.cmpi slt, %15, %18 : vector<8x128xi32>
    %20 = arith.andi %17, %19 : vector<8x128xi1>
    %cst_8 = arith.constant 2.000000e+00 : f32
    %cst_9 = arith.constant 1.000000e+00 : f32
    %21 = vector.broadcast %cst_8 : f32 to vector<8x128xf32>
    %22 = vector.broadcast %cst_9 : f32 to vector<8x128xf32>
    %23 = arith.select %20, %21, %22 : vector<8x128xi1>, vector<8x128xf32>
    %cst_10 = arith.constant -1.000000e+00 : f32
    %cst_11 = arith.constant 0.000000e+00 : f32
    %24 = vector.broadcast %cst_10 : f32 to vector<8x128xf32>
    %25 = vector.broadcast %cst_11 : f32 to vector<8x128xf32>
    %26 = arith.select %20, %24, %25 : vector<8x128xi1>, vector<8x128xf32>
    %cst_12 = arith.constant 0.000000e+00 : f32
    %27 = vector.broadcast %cst_12 : f32 to vector<8x32xf32>
    %cst_13 = arith.constant 0.000000e+00 : bf16
    %28 = vector.broadcast %cst_13 : bf16 to vector<8x32xbf16>
    %29 = vector.extract_strided_slice %5 {offsets = [0, 0], sizes = [8, 128], strides = [1, 1]} : vector<64x128xf32> to vector<8x128xf32>
    %cst_14 = arith.constant dense<0.000000e+00> : vector<8x128xf32>
    %30 = tpu.matmul %28, %7, %cst_14 {dimension_numbers = #tpu.dot_dimension_numbers<[1], [0], [0], [1], [0, 0, 1, 1], [], []>} : vector<8x32xbf16>, vector<32x128xbf16>, vector<8x128xf32> -> vector<8x128xf32>
    %31 = arith.addf %29, %30 : vector<8x128xf32>
    %cst_15 = arith.constant dense<0.000000e+00> : vector<8x128xf32>
    %32 = tpu.matmul %28, %11, %cst_15 {dimension_numbers = #tpu.dot_dimension_numbers<[1], [0], [0], [1], [0, 0, 1, 1], [], []>} : vector<8x32xbf16>, vector<32x128xbf16>, vector<8x128xf32> -> vector<8x128xf32>
    %33 = arith.addf %32, %14 : vector<8x128xf32>
    %34 = arith.mulf %31, %23 : vector<8x128xf32>
    %35 = arith.negf %34 : vector<8x128xf32>
    %36 = math.exp %35 : vector<8x128xf32>
    %cst_16 = arith.constant 1.000000e+00 : f32
    %37 = vector.broadcast %cst_16 : f32 to vector<8x128xf32>
    %38 = arith.addf %37, %36 : vector<8x128xf32>
    %39 = arith.divf %37, %38 : vector<8x128xf32>
    %40 = arith.mulf %39, %23 : vector<8x128xf32>
    %41 = arith.addf %40, %26 : vector<8x128xf32>
    %42 = vector.extract_strided_slice %41 {offsets = [0, 0], sizes = [8, 32], strides = [1, 1]} : vector<8x128xf32> to vector<8x32xf32>
    %43 = vector.extract_strided_slice %41 {offsets = [0, 32], sizes = [8, 32], strides = [1, 1]} : vector<8x128xf32> to vector<8x32xf32>
    %44 = vector.extract_strided_slice %41 {offsets = [0, 64], sizes = [8, 32], strides = [1, 1]} : vector<8x128xf32> to vector<8x32xf32>
    %45 = vector.extract_strided_slice %41 {offsets = [0, 96], sizes = [8, 32], strides = [1, 1]} : vector<8x128xf32> to vector<8x32xf32>
    %46 = arith.mulf %43, %27 : vector<8x32xf32>
    %47 = arith.mulf %42, %44 : vector<8x32xf32>
    %48 = arith.addf %46, %47 : vector<8x32xf32>
    %49 = math.tanh %48 : vector<8x32xf32>
    %50 = arith.mulf %45, %49 : vector<8x32xf32>
    %51 = arith.truncf %50 : vector<8x32xf32> to vector<8x32xbf16>
    %cst_17 = arith.constant dense<0.000000e+00> : vector<8x128xf32>
    %52 = tpu.matmul %51, %9, %cst_17 {dimension_numbers = #tpu.dot_dimension_numbers<[1], [0], [0], [1], [0, 0, 1, 1], [], []>} : vector<8x32xbf16>, vector<32x128xbf16>, vector<8x128xf32> -> vector<8x128xf32>
    %53 = arith.addf %52, %33 : vector<8x128xf32>
    %54 = arith.mulf %53, %23 : vector<8x128xf32>
    %55 = arith.negf %54 : vector<8x128xf32>
    %56 = math.exp %55 : vector<8x128xf32>
    %cst_18 = arith.constant 1.000000e+00 : f32
    %57 = vector.broadcast %cst_18 : f32 to vector<8x128xf32>
    %58 = arith.addf %57, %56 : vector<8x128xf32>
    %59 = arith.divf %57, %58 : vector<8x128xf32>
    %60 = arith.mulf %59, %23 : vector<8x128xf32>
    %61 = arith.addf %60, %26 : vector<8x128xf32>
    %62 = vector.extract_strided_slice %61 {offsets = [0, 0], sizes = [8, 32], strides = [1, 1]} : vector<8x128xf32> to vector<8x32xf32>
    %63 = vector.extract_strided_slice %61 {offsets = [0, 32], sizes = [8, 32], strides = [1, 1]} : vector<8x128xf32> to vector<8x32xf32>
    %64 = vector.extract_strided_slice %61 {offsets = [0, 64], sizes = [8, 32], strides = [1, 1]} : vector<8x128xf32> to vector<8x32xf32>
    %65 = vector.extract_strided_slice %61 {offsets = [0, 96], sizes = [8, 32], strides = [1, 1]} : vector<8x128xf32> to vector<8x32xf32>
    %66 = arith.mulf %63, %27 : vector<8x32xf32>
    %67 = arith.mulf %62, %64 : vector<8x32xf32>
    %68 = arith.addf %66, %67 : vector<8x32xf32>
    %69 = math.tanh %68 : vector<8x32xf32>
    %70 = arith.mulf %65, %69 : vector<8x32xf32>
    %71 = arith.truncf %70 : vector<8x32xf32> to vector<8x32xbf16>
    %72 = vector.extract_strided_slice %5 {offsets = [8, 0], sizes = [8, 128], strides = [1, 1]} : vector<64x128xf32> to vector<8x128xf32>
    %cst_19 = arith.constant dense<0.000000e+00> : vector<8x128xf32>
    %73 = tpu.matmul %51, %7, %cst_19 {dimension_numbers = #tpu.dot_dimension_numbers<[1], [0], [0], [1], [0, 0, 1, 1], [], []>} : vector<8x32xbf16>, vector<32x128xbf16>, vector<8x128xf32> -> vector<8x128xf32>
    %74 = arith.addf %72, %73 : vector<8x128xf32>
    %cst_20 = arith.constant dense<0.000000e+00> : vector<8x128xf32>
    %75 = tpu.matmul %71, %11, %cst_20 {dimension_numbers = #tpu.dot_dimension_numbers<[1], [0], [0], [1], [0, 0, 1, 1], [], []>} : vector<8x32xbf16>, vector<32x128xbf16>, vector<8x128xf32> -> vector<8x128xf32>
    %76 = arith.addf %75, %14 : vector<8x128xf32>
    %77 = arith.mulf %74, %23 : vector<8x128xf32>
    %78 = arith.negf %77 : vector<8x128xf32>
    %79 = math.exp %78 : vector<8x128xf32>
    %cst_21 = arith.constant 1.000000e+00 : f32
    %80 = vector.broadcast %cst_21 : f32 to vector<8x128xf32>
    %81 = arith.addf %80, %79 : vector<8x128xf32>
    %82 = arith.divf %80, %81 : vector<8x128xf32>
    %83 = arith.mulf %82, %23 : vector<8x128xf32>
    %84 = arith.addf %83, %26 : vector<8x128xf32>
    %85 = vector.extract_strided_slice %84 {offsets = [0, 0], sizes = [8, 32], strides = [1, 1]} : vector<8x128xf32> to vector<8x32xf32>
    %86 = vector.extract_strided_slice %84 {offsets = [0, 32], sizes = [8, 32], strides = [1, 1]} : vector<8x128xf32> to vector<8x32xf32>
    %87 = vector.extract_strided_slice %84 {offsets = [0, 64], sizes = [8, 32], strides = [1, 1]} : vector<8x128xf32> to vector<8x32xf32>
    %88 = vector.extract_strided_slice %84 {offsets = [0, 96], sizes = [8, 32], strides = [1, 1]} : vector<8x128xf32> to vector<8x32xf32>
    %89 = arith.mulf %86, %48 : vector<8x32xf32>
    %90 = arith.mulf %85, %87 : vector<8x32xf32>
    %91 = arith.addf %89, %90 : vector<8x32xf32>
    %92 = math.tanh %91 : vector<8x32xf32>
    %93 = arith.mulf %88, %92 : vector<8x32xf32>
    %94 = arith.truncf %93 : vector<8x32xf32> to vector<8x32xbf16>
    %cst_22 = arith.constant dense<0.000000e+00> : vector<8x128xf32>
    %95 = tpu.matmul %94, %9, %cst_22 {dimension_numbers = #tpu.dot_dimension_numbers<[1], [0], [0], [1], [0, 0, 1, 1], [], []>} : vector<8x32xbf16>, vector<32x128xbf16>, vector<8x128xf32> -> vector<8x128xf32>
    %96 = arith.addf %95, %76 : vector<8x128xf32>
    %97 = arith.mulf %96, %23 : vector<8x128xf32>
    %98 = arith.negf %97 : vector<8x128xf32>
    %99 = math.exp %98 : vector<8x128xf32>
    %cst_23 = arith.constant 1.000000e+00 : f32
    %100 = vector.broadcast %cst_23 : f32 to vector<8x128xf32>
    %101 = arith.addf %100, %99 : vector<8x128xf32>
    %102 = arith.divf %100, %101 : vector<8x128xf32>
    %103 = arith.mulf %102, %23 : vector<8x128xf32>
    %104 = arith.addf %103, %26 : vector<8x128xf32>
    %105 = vector.extract_strided_slice %104 {offsets = [0, 0], sizes = [8, 32], strides = [1, 1]} : vector<8x128xf32> to vector<8x32xf32>
    %106 = vector.extract_strided_slice %104 {offsets = [0, 32], sizes = [8, 32], strides = [1, 1]} : vector<8x128xf32> to vector<8x32xf32>
    %107 = vector.extract_strided_slice %104 {offsets = [0, 64], sizes = [8, 32], strides = [1, 1]} : vector<8x128xf32> to vector<8x32xf32>
    %108 = vector.extract_strided_slice %104 {offsets = [0, 96], sizes = [8, 32], strides = [1, 1]} : vector<8x128xf32> to vector<8x32xf32>
    %109 = arith.mulf %106, %68 : vector<8x32xf32>
    %110 = arith.mulf %105, %107 : vector<8x32xf32>
    %111 = arith.addf %109, %110 : vector<8x32xf32>
    %112 = math.tanh %111 : vector<8x32xf32>
    %113 = arith.mulf %108, %112 : vector<8x32xf32>
    %114 = arith.truncf %113 : vector<8x32xf32> to vector<8x32xbf16>
    %115 = vector.extract_strided_slice %5 {offsets = [16, 0], sizes = [8, 128], strides = [1, 1]} : vector<64x128xf32> to vector<8x128xf32>
    %cst_24 = arith.constant dense<0.000000e+00> : vector<8x128xf32>
    %116 = tpu.matmul %94, %7, %cst_24 {dimension_numbers = #tpu.dot_dimension_numbers<[1], [0], [0], [1], [0, 0, 1, 1], [], []>} : vector<8x32xbf16>, vector<32x128xbf16>, vector<8x128xf32> -> vector<8x128xf32>
    %117 = arith.addf %115, %116 : vector<8x128xf32>
    %cst_25 = arith.constant dense<0.000000e+00> : vector<8x128xf32>
    %118 = tpu.matmul %114, %11, %cst_25 {dimension_numbers = #tpu.dot_dimension_numbers<[1], [0], [0], [1], [0, 0, 1, 1], [], []>} : vector<8x32xbf16>, vector<32x128xbf16>, vector<8x128xf32> -> vector<8x128xf32>
    %119 = arith.addf %118, %14 : vector<8x128xf32>
    %120 = arith.mulf %117, %23 : vector<8x128xf32>
    %121 = arith.negf %120 : vector<8x128xf32>
    %122 = math.exp %121 : vector<8x128xf32>
    %cst_26 = arith.constant 1.000000e+00 : f32
    %123 = vector.broadcast %cst_26 : f32 to vector<8x128xf32>
    %124 = arith.addf %123, %122 : vector<8x128xf32>
    %125 = arith.divf %123, %124 : vector<8x128xf32>
    %126 = arith.mulf %125, %23 : vector<8x128xf32>
    %127 = arith.addf %126, %26 : vector<8x128xf32>
    %128 = vector.extract_strided_slice %127 {offsets = [0, 0], sizes = [8, 32], strides = [1, 1]} : vector<8x128xf32> to vector<8x32xf32>
    %129 = vector.extract_strided_slice %127 {offsets = [0, 32], sizes = [8, 32], strides = [1, 1]} : vector<8x128xf32> to vector<8x32xf32>
    %130 = vector.extract_strided_slice %127 {offsets = [0, 64], sizes = [8, 32], strides = [1, 1]} : vector<8x128xf32> to vector<8x32xf32>
    %131 = vector.extract_strided_slice %127 {offsets = [0, 96], sizes = [8, 32], strides = [1, 1]} : vector<8x128xf32> to vector<8x32xf32>
    %132 = arith.mulf %129, %91 : vector<8x32xf32>
    %133 = arith.mulf %128, %130 : vector<8x32xf32>
    %134 = arith.addf %132, %133 : vector<8x32xf32>
    %135 = math.tanh %134 : vector<8x32xf32>
    %136 = arith.mulf %131, %135 : vector<8x32xf32>
    %137 = arith.truncf %136 : vector<8x32xf32> to vector<8x32xbf16>
    %cst_27 = arith.constant dense<0.000000e+00> : vector<8x128xf32>
    %138 = tpu.matmul %137, %9, %cst_27 {dimension_numbers = #tpu.dot_dimension_numbers<[1], [0], [0], [1], [0, 0, 1, 1], [], []>} : vector<8x32xbf16>, vector<32x128xbf16>, vector<8x128xf32> -> vector<8x128xf32>
    %139 = arith.addf %138, %119 : vector<8x128xf32>
    %140 = arith.mulf %139, %23 : vector<8x128xf32>
    %141 = arith.negf %140 : vector<8x128xf32>
    %142 = math.exp %141 : vector<8x128xf32>
    %cst_28 = arith.constant 1.000000e+00 : f32
    %143 = vector.broadcast %cst_28 : f32 to vector<8x128xf32>
    %144 = arith.addf %143, %142 : vector<8x128xf32>
    %145 = arith.divf %143, %144 : vector<8x128xf32>
    %146 = arith.mulf %145, %23 : vector<8x128xf32>
    %147 = arith.addf %146, %26 : vector<8x128xf32>
    %148 = vector.extract_strided_slice %147 {offsets = [0, 0], sizes = [8, 32], strides = [1, 1]} : vector<8x128xf32> to vector<8x32xf32>
    %149 = vector.extract_strided_slice %147 {offsets = [0, 32], sizes = [8, 32], strides = [1, 1]} : vector<8x128xf32> to vector<8x32xf32>
    %150 = vector.extract_strided_slice %147 {offsets = [0, 64], sizes = [8, 32], strides = [1, 1]} : vector<8x128xf32> to vector<8x32xf32>
    %151 = vector.extract_strided_slice %147 {offsets = [0, 96], sizes = [8, 32], strides = [1, 1]} : vector<8x128xf32> to vector<8x32xf32>
    %152 = arith.mulf %149, %111 : vector<8x32xf32>
    %153 = arith.mulf %148, %150 : vector<8x32xf32>
    %154 = arith.addf %152, %153 : vector<8x32xf32>
    %155 = math.tanh %154 : vector<8x32xf32>
    %156 = arith.mulf %151, %155 : vector<8x32xf32>
    %157 = arith.truncf %156 : vector<8x32xf32> to vector<8x32xbf16>
    %158 = vector.extract_strided_slice %5 {offsets = [24, 0], sizes = [8, 128], strides = [1, 1]} : vector<64x128xf32> to vector<8x128xf32>
    %cst_29 = arith.constant dense<0.000000e+00> : vector<8x128xf32>
    %159 = tpu.matmul %137, %7, %cst_29 {dimension_numbers = #tpu.dot_dimension_numbers<[1], [0], [0], [1], [0, 0, 1, 1], [], []>} : vector<8x32xbf16>, vector<32x128xbf16>, vector<8x128xf32> -> vector<8x128xf32>
    %160 = arith.addf %158, %159 : vector<8x128xf32>
    %cst_30 = arith.constant dense<0.000000e+00> : vector<8x128xf32>
    %161 = tpu.matmul %157, %11, %cst_30 {dimension_numbers = #tpu.dot_dimension_numbers<[1], [0], [0], [1], [0, 0, 1, 1], [], []>} : vector<8x32xbf16>, vector<32x128xbf16>, vector<8x128xf32> -> vector<8x128xf32>
    %162 = arith.addf %161, %14 : vector<8x128xf32>
    %163 = arith.mulf %160, %23 : vector<8x128xf32>
    %164 = arith.negf %163 : vector<8x128xf32>
    %165 = math.exp %164 : vector<8x128xf32>
    %cst_31 = arith.constant 1.000000e+00 : f32
    %166 = vector.broadcast %cst_31 : f32 to vector<8x128xf32>
    %167 = arith.addf %166, %165 : vector<8x128xf32>
    %168 = arith.divf %166, %167 : vector<8x128xf32>
    %169 = arith.mulf %168, %23 : vector<8x128xf32>
    %170 = arith.addf %169, %26 : vector<8x128xf32>
    %171 = vector.extract_strided_slice %170 {offsets = [0, 0], sizes = [8, 32], strides = [1, 1]} : vector<8x128xf32> to vector<8x32xf32>
    %172 = vector.extract_strided_slice %170 {offsets = [0, 32], sizes = [8, 32], strides = [1, 1]} : vector<8x128xf32> to vector<8x32xf32>
    %173 = vector.extract_strided_slice %170 {offsets = [0, 64], sizes = [8, 32], strides = [1, 1]} : vector<8x128xf32> to vector<8x32xf32>
    %174 = vector.extract_strided_slice %170 {offsets = [0, 96], sizes = [8, 32], strides = [1, 1]} : vector<8x128xf32> to vector<8x32xf32>
    %175 = arith.mulf %172, %134 : vector<8x32xf32>
    %176 = arith.mulf %171, %173 : vector<8x32xf32>
    %177 = arith.addf %175, %176 : vector<8x32xf32>
    %178 = math.tanh %177 : vector<8x32xf32>
    %179 = arith.mulf %174, %178 : vector<8x32xf32>
    %180 = arith.truncf %179 : vector<8x32xf32> to vector<8x32xbf16>
    %cst_32 = arith.constant dense<0.000000e+00> : vector<8x128xf32>
    %181 = tpu.matmul %180, %9, %cst_32 {dimension_numbers = #tpu.dot_dimension_numbers<[1], [0], [0], [1], [0, 0, 1, 1], [], []>} : vector<8x32xbf16>, vector<32x128xbf16>, vector<8x128xf32> -> vector<8x128xf32>
    %182 = arith.addf %181, %162 : vector<8x128xf32>
    %183 = arith.mulf %182, %23 : vector<8x128xf32>
    %184 = arith.negf %183 : vector<8x128xf32>
    %185 = math.exp %184 : vector<8x128xf32>
    %cst_33 = arith.constant 1.000000e+00 : f32
    %186 = vector.broadcast %cst_33 : f32 to vector<8x128xf32>
    %187 = arith.addf %186, %185 : vector<8x128xf32>
    %188 = arith.divf %186, %187 : vector<8x128xf32>
    %189 = arith.mulf %188, %23 : vector<8x128xf32>
    %190 = arith.addf %189, %26 : vector<8x128xf32>
    %191 = vector.extract_strided_slice %190 {offsets = [0, 0], sizes = [8, 32], strides = [1, 1]} : vector<8x128xf32> to vector<8x32xf32>
    %192 = vector.extract_strided_slice %190 {offsets = [0, 32], sizes = [8, 32], strides = [1, 1]} : vector<8x128xf32> to vector<8x32xf32>
    %193 = vector.extract_strided_slice %190 {offsets = [0, 64], sizes = [8, 32], strides = [1, 1]} : vector<8x128xf32> to vector<8x32xf32>
    %194 = vector.extract_strided_slice %190 {offsets = [0, 96], sizes = [8, 32], strides = [1, 1]} : vector<8x128xf32> to vector<8x32xf32>
    %195 = arith.mulf %192, %154 : vector<8x32xf32>
    %196 = arith.mulf %191, %193 : vector<8x32xf32>
    %197 = arith.addf %195, %196 : vector<8x32xf32>
    %198 = math.tanh %197 : vector<8x32xf32>
    %199 = arith.mulf %194, %198 : vector<8x32xf32>
    %200 = arith.truncf %199 : vector<8x32xf32> to vector<8x32xbf16>
    %201 = vector.extract_strided_slice %5 {offsets = [32, 0], sizes = [8, 128], strides = [1, 1]} : vector<64x128xf32> to vector<8x128xf32>
    %cst_34 = arith.constant dense<0.000000e+00> : vector<8x128xf32>
    %202 = tpu.matmul %180, %7, %cst_34 {dimension_numbers = #tpu.dot_dimension_numbers<[1], [0], [0], [1], [0, 0, 1, 1], [], []>} : vector<8x32xbf16>, vector<32x128xbf16>, vector<8x128xf32> -> vector<8x128xf32>
    %203 = arith.addf %201, %202 : vector<8x128xf32>
    %cst_35 = arith.constant dense<0.000000e+00> : vector<8x128xf32>
    %204 = tpu.matmul %200, %11, %cst_35 {dimension_numbers = #tpu.dot_dimension_numbers<[1], [0], [0], [1], [0, 0, 1, 1], [], []>} : vector<8x32xbf16>, vector<32x128xbf16>, vector<8x128xf32> -> vector<8x128xf32>
    %205 = arith.addf %204, %14 : vector<8x128xf32>
    %206 = arith.mulf %203, %23 : vector<8x128xf32>
    %207 = arith.negf %206 : vector<8x128xf32>
    %208 = math.exp %207 : vector<8x128xf32>
    %cst_36 = arith.constant 1.000000e+00 : f32
    %209 = vector.broadcast %cst_36 : f32 to vector<8x128xf32>
    %210 = arith.addf %209, %208 : vector<8x128xf32>
    %211 = arith.divf %209, %210 : vector<8x128xf32>
    %212 = arith.mulf %211, %23 : vector<8x128xf32>
    %213 = arith.addf %212, %26 : vector<8x128xf32>
    %214 = vector.extract_strided_slice %213 {offsets = [0, 0], sizes = [8, 32], strides = [1, 1]} : vector<8x128xf32> to vector<8x32xf32>
    %215 = vector.extract_strided_slice %213 {offsets = [0, 32], sizes = [8, 32], strides = [1, 1]} : vector<8x128xf32> to vector<8x32xf32>
    %216 = vector.extract_strided_slice %213 {offsets = [0, 64], sizes = [8, 32], strides = [1, 1]} : vector<8x128xf32> to vector<8x32xf32>
    %217 = vector.extract_strided_slice %213 {offsets = [0, 96], sizes = [8, 32], strides = [1, 1]} : vector<8x128xf32> to vector<8x32xf32>
    %218 = arith.mulf %215, %177 : vector<8x32xf32>
    %219 = arith.mulf %214, %216 : vector<8x32xf32>
    %220 = arith.addf %218, %219 : vector<8x32xf32>
    %221 = math.tanh %220 : vector<8x32xf32>
    %222 = arith.mulf %217, %221 : vector<8x32xf32>
    %223 = arith.truncf %222 : vector<8x32xf32> to vector<8x32xbf16>
    %cst_37 = arith.constant dense<0.000000e+00> : vector<8x128xf32>
    %224 = tpu.matmul %223, %9, %cst_37 {dimension_numbers = #tpu.dot_dimension_numbers<[1], [0], [0], [1], [0, 0, 1, 1], [], []>} : vector<8x32xbf16>, vector<32x128xbf16>, vector<8x128xf32> -> vector<8x128xf32>
    %225 = arith.addf %224, %205 : vector<8x128xf32>
    %226 = arith.mulf %225, %23 : vector<8x128xf32>
    %227 = arith.negf %226 : vector<8x128xf32>
    %228 = math.exp %227 : vector<8x128xf32>
    %cst_38 = arith.constant 1.000000e+00 : f32
    %229 = vector.broadcast %cst_38 : f32 to vector<8x128xf32>
    %230 = arith.addf %229, %228 : vector<8x128xf32>
    %231 = arith.divf %229, %230 : vector<8x128xf32>
    %232 = arith.mulf %231, %23 : vector<8x128xf32>
    %233 = arith.addf %232, %26 : vector<8x128xf32>
    %234 = vector.extract_strided_slice %233 {offsets = [0, 0], sizes = [8, 32], strides = [1, 1]} : vector<8x128xf32> to vector<8x32xf32>
    %235 = vector.extract_strided_slice %233 {offsets = [0, 32], sizes = [8, 32], strides = [1, 1]} : vector<8x128xf32> to vector<8x32xf32>
    %236 = vector.extract_strided_slice %233 {offsets = [0, 64], sizes = [8, 32], strides = [1, 1]} : vector<8x128xf32> to vector<8x32xf32>
    %237 = vector.extract_strided_slice %233 {offsets = [0, 96], sizes = [8, 32], strides = [1, 1]} : vector<8x128xf32> to vector<8x32xf32>
    %238 = arith.mulf %235, %197 : vector<8x32xf32>
    %239 = arith.mulf %234, %236 : vector<8x32xf32>
    %240 = arith.addf %238, %239 : vector<8x32xf32>
    %241 = math.tanh %240 : vector<8x32xf32>
    %242 = arith.mulf %237, %241 : vector<8x32xf32>
    %243 = arith.truncf %242 : vector<8x32xf32> to vector<8x32xbf16>
    %244 = vector.extract_strided_slice %5 {offsets = [40, 0], sizes = [8, 128], strides = [1, 1]} : vector<64x128xf32> to vector<8x128xf32>
    %cst_39 = arith.constant dense<0.000000e+00> : vector<8x128xf32>
    %245 = tpu.matmul %223, %7, %cst_39 {dimension_numbers = #tpu.dot_dimension_numbers<[1], [0], [0], [1], [0, 0, 1, 1], [], []>} : vector<8x32xbf16>, vector<32x128xbf16>, vector<8x128xf32> -> vector<8x128xf32>
    %246 = arith.addf %244, %245 : vector<8x128xf32>
    %cst_40 = arith.constant dense<0.000000e+00> : vector<8x128xf32>
    %247 = tpu.matmul %243, %11, %cst_40 {dimension_numbers = #tpu.dot_dimension_numbers<[1], [0], [0], [1], [0, 0, 1, 1], [], []>} : vector<8x32xbf16>, vector<32x128xbf16>, vector<8x128xf32> -> vector<8x128xf32>
    %248 = arith.addf %247, %14 : vector<8x128xf32>
    %249 = arith.mulf %246, %23 : vector<8x128xf32>
    %250 = arith.negf %249 : vector<8x128xf32>
    %251 = math.exp %250 : vector<8x128xf32>
    %cst_41 = arith.constant 1.000000e+00 : f32
    %252 = vector.broadcast %cst_41 : f32 to vector<8x128xf32>
    %253 = arith.addf %252, %251 : vector<8x128xf32>
    %254 = arith.divf %252, %253 : vector<8x128xf32>
    %255 = arith.mulf %254, %23 : vector<8x128xf32>
    %256 = arith.addf %255, %26 : vector<8x128xf32>
    %257 = vector.extract_strided_slice %256 {offsets = [0, 0], sizes = [8, 32], strides = [1, 1]} : vector<8x128xf32> to vector<8x32xf32>
    %258 = vector.extract_strided_slice %256 {offsets = [0, 32], sizes = [8, 32], strides = [1, 1]} : vector<8x128xf32> to vector<8x32xf32>
    %259 = vector.extract_strided_slice %256 {offsets = [0, 64], sizes = [8, 32], strides = [1, 1]} : vector<8x128xf32> to vector<8x32xf32>
    %260 = vector.extract_strided_slice %256 {offsets = [0, 96], sizes = [8, 32], strides = [1, 1]} : vector<8x128xf32> to vector<8x32xf32>
    %261 = arith.mulf %258, %220 : vector<8x32xf32>
    %262 = arith.mulf %257, %259 : vector<8x32xf32>
    %263 = arith.addf %261, %262 : vector<8x32xf32>
    %264 = math.tanh %263 : vector<8x32xf32>
    %265 = arith.mulf %260, %264 : vector<8x32xf32>
    %266 = arith.truncf %265 : vector<8x32xf32> to vector<8x32xbf16>
    %cst_42 = arith.constant dense<0.000000e+00> : vector<8x128xf32>
    %267 = tpu.matmul %266, %9, %cst_42 {dimension_numbers = #tpu.dot_dimension_numbers<[1], [0], [0], [1], [0, 0, 1, 1], [], []>} : vector<8x32xbf16>, vector<32x128xbf16>, vector<8x128xf32> -> vector<8x128xf32>
    %268 = arith.addf %267, %248 : vector<8x128xf32>
    %269 = arith.mulf %268, %23 : vector<8x128xf32>
    %270 = arith.negf %269 : vector<8x128xf32>
    %271 = math.exp %270 : vector<8x128xf32>
    %cst_43 = arith.constant 1.000000e+00 : f32
    %272 = vector.broadcast %cst_43 : f32 to vector<8x128xf32>
    %273 = arith.addf %272, %271 : vector<8x128xf32>
    %274 = arith.divf %272, %273 : vector<8x128xf32>
    %275 = arith.mulf %274, %23 : vector<8x128xf32>
    %276 = arith.addf %275, %26 : vector<8x128xf32>
    %277 = vector.extract_strided_slice %276 {offsets = [0, 0], sizes = [8, 32], strides = [1, 1]} : vector<8x128xf32> to vector<8x32xf32>
    %278 = vector.extract_strided_slice %276 {offsets = [0, 32], sizes = [8, 32], strides = [1, 1]} : vector<8x128xf32> to vector<8x32xf32>
    %279 = vector.extract_strided_slice %276 {offsets = [0, 64], sizes = [8, 32], strides = [1, 1]} : vector<8x128xf32> to vector<8x32xf32>
    %280 = vector.extract_strided_slice %276 {offsets = [0, 96], sizes = [8, 32], strides = [1, 1]} : vector<8x128xf32> to vector<8x32xf32>
    %281 = arith.mulf %278, %240 : vector<8x32xf32>
    %282 = arith.mulf %277, %279 : vector<8x32xf32>
    %283 = arith.addf %281, %282 : vector<8x32xf32>
    %284 = math.tanh %283 : vector<8x32xf32>
    %285 = arith.mulf %280, %284 : vector<8x32xf32>
    %286 = arith.truncf %285 : vector<8x32xf32> to vector<8x32xbf16>
    %287 = vector.extract_strided_slice %5 {offsets = [48, 0], sizes = [8, 128], strides = [1, 1]} : vector<64x128xf32> to vector<8x128xf32>
    %cst_44 = arith.constant dense<0.000000e+00> : vector<8x128xf32>
    %288 = tpu.matmul %266, %7, %cst_44 {dimension_numbers = #tpu.dot_dimension_numbers<[1], [0], [0], [1], [0, 0, 1, 1], [], []>} : vector<8x32xbf16>, vector<32x128xbf16>, vector<8x128xf32> -> vector<8x128xf32>
    %289 = arith.addf %287, %288 : vector<8x128xf32>
    %cst_45 = arith.constant dense<0.000000e+00> : vector<8x128xf32>
    %290 = tpu.matmul %286, %11, %cst_45 {dimension_numbers = #tpu.dot_dimension_numbers<[1], [0], [0], [1], [0, 0, 1, 1], [], []>} : vector<8x32xbf16>, vector<32x128xbf16>, vector<8x128xf32> -> vector<8x128xf32>
    %291 = arith.addf %290, %14 : vector<8x128xf32>
    %292 = arith.mulf %289, %23 : vector<8x128xf32>
    %293 = arith.negf %292 : vector<8x128xf32>
    %294 = math.exp %293 : vector<8x128xf32>
    %cst_46 = arith.constant 1.000000e+00 : f32
    %295 = vector.broadcast %cst_46 : f32 to vector<8x128xf32>
    %296 = arith.addf %295, %294 : vector<8x128xf32>
    %297 = arith.divf %295, %296 : vector<8x128xf32>
    %298 = arith.mulf %297, %23 : vector<8x128xf32>
    %299 = arith.addf %298, %26 : vector<8x128xf32>
    %300 = vector.extract_strided_slice %299 {offsets = [0, 0], sizes = [8, 32], strides = [1, 1]} : vector<8x128xf32> to vector<8x32xf32>
    %301 = vector.extract_strided_slice %299 {offsets = [0, 32], sizes = [8, 32], strides = [1, 1]} : vector<8x128xf32> to vector<8x32xf32>
    %302 = vector.extract_strided_slice %299 {offsets = [0, 64], sizes = [8, 32], strides = [1, 1]} : vector<8x128xf32> to vector<8x32xf32>
    %303 = vector.extract_strided_slice %299 {offsets = [0, 96], sizes = [8, 32], strides = [1, 1]} : vector<8x128xf32> to vector<8x32xf32>
    %304 = arith.mulf %301, %263 : vector<8x32xf32>
    %305 = arith.mulf %300, %302 : vector<8x32xf32>
    %306 = arith.addf %304, %305 : vector<8x32xf32>
    %307 = math.tanh %306 : vector<8x32xf32>
    %308 = arith.mulf %303, %307 : vector<8x32xf32>
    %309 = arith.truncf %308 : vector<8x32xf32> to vector<8x32xbf16>
    %cst_47 = arith.constant dense<0.000000e+00> : vector<8x128xf32>
    %310 = tpu.matmul %309, %9, %cst_47 {dimension_numbers = #tpu.dot_dimension_numbers<[1], [0], [0], [1], [0, 0, 1, 1], [], []>} : vector<8x32xbf16>, vector<32x128xbf16>, vector<8x128xf32> -> vector<8x128xf32>
    %311 = arith.addf %310, %291 : vector<8x128xf32>
    %312 = arith.mulf %311, %23 : vector<8x128xf32>
    %313 = arith.negf %312 : vector<8x128xf32>
    %314 = math.exp %313 : vector<8x128xf32>
    %cst_48 = arith.constant 1.000000e+00 : f32
    %315 = vector.broadcast %cst_48 : f32 to vector<8x128xf32>
    %316 = arith.addf %315, %314 : vector<8x128xf32>
    %317 = arith.divf %315, %316 : vector<8x128xf32>
    %318 = arith.mulf %317, %23 : vector<8x128xf32>
    %319 = arith.addf %318, %26 : vector<8x128xf32>
    %320 = vector.extract_strided_slice %319 {offsets = [0, 0], sizes = [8, 32], strides = [1, 1]} : vector<8x128xf32> to vector<8x32xf32>
    %321 = vector.extract_strided_slice %319 {offsets = [0, 32], sizes = [8, 32], strides = [1, 1]} : vector<8x128xf32> to vector<8x32xf32>
    %322 = vector.extract_strided_slice %319 {offsets = [0, 64], sizes = [8, 32], strides = [1, 1]} : vector<8x128xf32> to vector<8x32xf32>
    %323 = vector.extract_strided_slice %319 {offsets = [0, 96], sizes = [8, 32], strides = [1, 1]} : vector<8x128xf32> to vector<8x32xf32>
    %324 = arith.mulf %321, %283 : vector<8x32xf32>
    %325 = arith.mulf %320, %322 : vector<8x32xf32>
    %326 = arith.addf %324, %325 : vector<8x32xf32>
    %327 = math.tanh %326 : vector<8x32xf32>
    %328 = arith.mulf %323, %327 : vector<8x32xf32>
    %329 = arith.truncf %328 : vector<8x32xf32> to vector<8x32xbf16>
    %330 = vector.extract_strided_slice %5 {offsets = [56, 0], sizes = [8, 128], strides = [1, 1]} : vector<64x128xf32> to vector<8x128xf32>
    %cst_49 = arith.constant dense<0.000000e+00> : vector<8x128xf32>
    %331 = tpu.matmul %309, %7, %cst_49 {dimension_numbers = #tpu.dot_dimension_numbers<[1], [0], [0], [1], [0, 0, 1, 1], [], []>} : vector<8x32xbf16>, vector<32x128xbf16>, vector<8x128xf32> -> vector<8x128xf32>
    %332 = arith.addf %330, %331 : vector<8x128xf32>
    %cst_50 = arith.constant dense<0.000000e+00> : vector<8x128xf32>
    %333 = tpu.matmul %329, %11, %cst_50 {dimension_numbers = #tpu.dot_dimension_numbers<[1], [0], [0], [1], [0, 0, 1, 1], [], []>} : vector<8x32xbf16>, vector<32x128xbf16>, vector<8x128xf32> -> vector<8x128xf32>
    %334 = arith.addf %333, %14 : vector<8x128xf32>
    %335 = arith.mulf %332, %23 : vector<8x128xf32>
    %336 = arith.negf %335 : vector<8x128xf32>
    %337 = math.exp %336 : vector<8x128xf32>
    %cst_51 = arith.constant 1.000000e+00 : f32
    %338 = vector.broadcast %cst_51 : f32 to vector<8x128xf32>
    %339 = arith.addf %338, %337 : vector<8x128xf32>
    %340 = arith.divf %338, %339 : vector<8x128xf32>
    %341 = arith.mulf %340, %23 : vector<8x128xf32>
    %342 = arith.addf %341, %26 : vector<8x128xf32>
    %343 = vector.extract_strided_slice %342 {offsets = [0, 0], sizes = [8, 32], strides = [1, 1]} : vector<8x128xf32> to vector<8x32xf32>
    %344 = vector.extract_strided_slice %342 {offsets = [0, 32], sizes = [8, 32], strides = [1, 1]} : vector<8x128xf32> to vector<8x32xf32>
    %345 = vector.extract_strided_slice %342 {offsets = [0, 64], sizes = [8, 32], strides = [1, 1]} : vector<8x128xf32> to vector<8x32xf32>
    %346 = vector.extract_strided_slice %342 {offsets = [0, 96], sizes = [8, 32], strides = [1, 1]} : vector<8x128xf32> to vector<8x32xf32>
    %347 = arith.mulf %344, %306 : vector<8x32xf32>
    %348 = arith.mulf %343, %345 : vector<8x32xf32>
    %349 = arith.addf %347, %348 : vector<8x32xf32>
    %350 = math.tanh %349 : vector<8x32xf32>
    %351 = arith.mulf %346, %350 : vector<8x32xf32>
    %352 = arith.truncf %351 : vector<8x32xf32> to vector<8x32xbf16>
    %cst_52 = arith.constant dense<0.000000e+00> : vector<8x128xf32>
    %353 = tpu.matmul %352, %9, %cst_52 {dimension_numbers = #tpu.dot_dimension_numbers<[1], [0], [0], [1], [0, 0, 1, 1], [], []>} : vector<8x32xbf16>, vector<32x128xbf16>, vector<8x128xf32> -> vector<8x128xf32>
    %354 = arith.addf %353, %334 : vector<8x128xf32>
    %355 = arith.mulf %354, %23 : vector<8x128xf32>
    %356 = arith.negf %355 : vector<8x128xf32>
    %357 = math.exp %356 : vector<8x128xf32>
    %cst_53 = arith.constant 1.000000e+00 : f32
    %358 = vector.broadcast %cst_53 : f32 to vector<8x128xf32>
    %359 = arith.addf %358, %357 : vector<8x128xf32>
    %360 = arith.divf %358, %359 : vector<8x128xf32>
    %361 = arith.mulf %360, %23 : vector<8x128xf32>
    %362 = arith.addf %361, %26 : vector<8x128xf32>
    %363 = vector.extract_strided_slice %362 {offsets = [0, 0], sizes = [8, 32], strides = [1, 1]} : vector<8x128xf32> to vector<8x32xf32>
    %364 = vector.extract_strided_slice %362 {offsets = [0, 32], sizes = [8, 32], strides = [1, 1]} : vector<8x128xf32> to vector<8x32xf32>
    %365 = vector.extract_strided_slice %362 {offsets = [0, 64], sizes = [8, 32], strides = [1, 1]} : vector<8x128xf32> to vector<8x32xf32>
    %366 = vector.extract_strided_slice %362 {offsets = [0, 96], sizes = [8, 32], strides = [1, 1]} : vector<8x128xf32> to vector<8x32xf32>
    %367 = arith.mulf %364, %326 : vector<8x32xf32>
    %368 = arith.mulf %363, %365 : vector<8x32xf32>
    %369 = arith.addf %367, %368 : vector<8x32xf32>
    %370 = math.tanh %369 : vector<8x32xf32>
    %371 = arith.mulf %366, %370 : vector<8x32xf32>
    %c128 = arith.constant 128 : index
    %c0_54 = arith.constant 0 : index
    %372 = vector.load %arg2[%c128, %c0_54] : memref<184x128xf32, #tpu.memory_space<vmem>>, vector<32x128xf32>
    %c160 = arith.constant 160 : index
    %c0_55 = arith.constant 0 : index
    %373 = vector.load %arg2[%c160, %c0_55] : memref<184x128xf32, #tpu.memory_space<vmem>>, vector<1x128xf32>
    %c168 = arith.constant 168 : index
    %c0_56 = arith.constant 0 : index
    %374 = vector.load %arg2[%c168, %c0_56] : memref<184x128xf32, #tpu.memory_space<vmem>>, vector<1x128xf32>
    %c176 = arith.constant 176 : index
    %c0_57 = arith.constant 0 : index
    %375 = vector.load %arg2[%c176, %c0_57] : memref<184x128xf32, #tpu.memory_space<vmem>>, vector<1x128xf32>
    %376 = vector.extract_strided_slice %375 {offsets = [0, 0], sizes = [1, 1], strides = [1, 1]} : vector<1x128xf32> to vector<1x1xf32>
    %cst_58 = arith.constant dense<0.000000e+00> : vector<8x128xf32>
    %377 = tpu.matmul %371, %372, %cst_58 {dimension_numbers = #tpu.dot_dimension_numbers<[1], [0], [0], [1], [0, 0, 1, 1], [], []>} : vector<8x32xf32>, vector<32x128xf32>, vector<8x128xf32> -> vector<8x128xf32>
    %378 = vector.broadcast %373 : vector<1x128xf32> to vector<8x128xf32>
    %379 = arith.addf %377, %378 : vector<8x128xf32>
    %cst_59 = arith.constant 0.000000e+00 : f32
    %380 = vector.broadcast %cst_59 : f32 to vector<8x128xf32>
    %381 = arith.maximumf %379, %380 : vector<8x128xf32>
    %382 = vector.broadcast %374 : vector<1x128xf32> to vector<8x128xf32>
    %383 = arith.mulf %381, %382 : vector<8x128xf32>
    %cst_60 = arith.constant dense<0.000000e+00> : vector<8xf32>
    %384 = vector.multi_reduction <add>, %383, %cst_60 [1] : vector<8x128xf32> to vector<8xf32>
    %385 = vector.shape_cast %384 : vector<8xf32> to vector<8x1xf32>
    %386 = vector.broadcast %376 : vector<1x1xf32> to vector<8x1xf32>
    %387 = arith.addf %385, %386 : vector<8x1xf32>
    %c0_61 = arith.constant 0 : index
    %c0_62 = arith.constant 0 : index
    %388 = vector.load %arg3[%c0_61, %c0_62] : memref<8x1xf32, #tpu.memory_space<vmem>>, vector<8x1xf32>
    tpu.vector_store %arg3[%c0_61, %c0_62], %387 {strides = array<i32>} : memref<8x1xf32, #tpu.memory_space<vmem>>, vector<8x1xf32>,
    return
  }
  func.func @transform_0(%arg0: i32) -> (i32, i32) {
    %c0_i32 = arith.constant 0 : i32
    %c0_i32_0 = arith.constant 0 : i32
    %c0_i32_1 = arith.constant 0 : i32
    return %c0_i32, %c0_i32_0 : i32, i32
  }
  func.func @transform_1(%arg0: i32) -> (i32, i32) {
    %c0_i32 = arith.constant 0 : i32
    %c0_i32_0 = arith.constant 0 : i32
    %c0_i32_1 = arith.constant 0 : i32
    return %c0_i32, %c0_i32_0 : i32, i32
  }
  func.func @transform_2(%arg0: i32) -> (i32, i32) {
    %c0_i32 = arith.constant 0 : i32
    %c0_i32_0 = arith.constant 0 : i32
    %c0_i32_1 = arith.constant 0 : i32
    return %c0_i32, %c0_i32_0 : i32, i32
  }
}

</mosaic_0001>

<bundles_post_ra>
// kernel: lstm_model_forward.1
= control target key start
LH: loop header
LB: loop body
LE: loop exit
PB: predicated region body
PF: predicated region fallthrough
CT: control target
= control target key end

     0   :  { %vm24_vm0 = vcmask 130048   ;;  %v1371_v9 = vmov 0   ;;  %v110_v10 = vlaneseq  ;;  %v1372_v16 = vmov 1.0   ;;  %s1374_s25 = smov 64   ;;  %s1375_s26 = smov 32   ;;  %s1795_s1 = inlined_call_operand.vmem [shape: f32[184,128], index: 1, kind: input, shape index: {}]   ;;  %s1796_s0 = inlined_call_operand.vmem [shape: f32[64,16], index: 0, kind: input, shape index: {}]   ;;  %s1797_s2 = inlined_call_operand.vmem [shape: f32[8,1], index: 2, kind: output, shape index: {}]  }
   0x1   :  { %v92_v0 = vld [vmem:[%s1795_s1 + $0x20] sm:$0xff]  ;;  %v93_v1 = vld [vmem:[%s1795_s1 + $0x28] sm:$0xff]  ;;  %v90_v5 = vld [vmem:[%s1795_s1 + $0x10] sm:$0xff]  ;;  %v1373_v34 = vmov 0.0   ;;  %vm117_vm8 = vcmask 261120  }
   0x2   :  { %v13_v2 = vld [vmem:[%s1795_s1 + $0x8] sm:$0xff]  ;;  %v1400_v3 = vpack.c.bf16 %v93_v1, %v92_v0  ;;  %v12_v4 = vld [vmem:[%s1795_s1] sm:$0xff]  ;;  %v91_v6 = vld [vmem:[%s1795_s1 + $0x18] sm:$0xff]  ;;  %v111_v11 = vand.u32 127, %v110_v10 }
   0x3   :  { %63 = vmatpush.msra.mxu0 %v13_v2  ;;  %v15_v7 = vld [vmem:[%s1796_s0] sm:$0xff]  ;;  %v1415_v8 = vpack.c.bf16 %v91_v6, %v90_v5  ;;  %v1429_v12 = vld [vmem:[%s1795_s1 + $0x70] ss:$0 sm:$0xff]  ;;  %v105_v46 = vld [vmem:[%s1795_s1 + $0x68] sm:$0xff] }
   0x4   :  { %127 = vmatpush.bf16.msra.mxu1 %v1400_v3  ;;  %vm112_vm1 = vcmp.ge.s32.totalorder %v111_v11, 64  ;;  %vm113_vm2 = vcmp.lt.s32.totalorder %v111_v11, 96  ;;  %v104_v45 = vld [vmem:[%s1795_s1 + $0x60] sm:$0xff]  ;;  %v102_v47 = vld [vmem:[%s1795_s1 + $0x50] sm:$0xff]  ;;  %v103_v49 = vld [vmem:[%s1795_s1 + $0x58] sm:$0xff] }
   0x5   :  { %64 = vmatpush.msra.mxu0 %v12_v4  ;;  %vm1432_vm3 = vmand %vm112_vm1, %vm113_vm2  ;;  %v1462_v48 = vpack.c.bf16 %v105_v46, %v104_v45  ;;  %v98_v50 = vld [vmem:[%s1795_s1 + $0x40] sm:$0xff]  ;;  %v99_v51 = vld [vmem:[%s1795_s1 + $0x48] sm:$0xff]  ;;  %v1485_v56 = vpack.c.bf16 %v103_v49, %v102_v47 }
   0x6   :  { %1216 = vmatmul.msk.f32.vlgmr.msra.gmra.mxu0 %vm24_vm0, %v15_v7  ;;  %v1438_v17 = vsel %vm1432_vm3, 2.0, %v1372_v16  ;;  %v1443_v35 = vsel %vm1432_vm3, -1.0, %v1373_v34  ;;  %v1473_v52 = vpack.c.bf16 %v99_v51, %v98_v50  ;;  %v96_v53 = vld [vmem:[%s1795_s1 + $0x30] sm:$0xff]  ;;  %v97_v54 = vld [vmem:[%s1795_s1 + $0x38] sm:$0xff]  ;;  %v16_v55 = vld [vmem:[%s1796_s0 + $0x8] sm:$0xff] }
   0x7   :  { %649 = vmatpush.bf16.msrb.mxu0 %v1400_v3  ;;  %141 = vmatpush.bf16.msra.mxu2 %v1462_v48  ;;  %v1489_v57 = vpack.c.bf16 %v97_v54, %v96_v53  ;;  %v1513_v2 = vld [vmem:[%s1795_s1 + $0x78] ss:$0 sm:$0xff] }
   0x8   :  { %128 = vmatpush.bf16.msra.mxu1 %v1415_v8  ;;  %200 = vmatpush.bf16.msra.mxu3 %v1473_v52 }
   0xb   :  { %650 = vmatpush.bf16.msrb.mxu0 %v1415_v8  ;;  %129 = vmatmul.bf16.vlgmr.msra.gmra.mxu1 %v1371_v9 }
   0xc   :  { %253 = vmatpush.bf16.msrb.mxu1 %v1400_v3  ;;  %142 = vmatpush.bf16.msra.mxu2 %v1485_v56 }
   0xd   :  { %201 = vmatpush.bf16.msra.mxu3 %v1489_v57 }
   0xe   :  { %1217 = vmatmul.msk.f32.gmra.mxu0 %vm24_vm0, %v16_v55 }
   0xf   :  { %801 = vmatpush.bf16.msra.mxu0 %v1462_v48  ;;  %143 = vmatmul.bf16.vlgmr.msra.gmra.mxu2 %v1371_v9 }
  0x10   :  { %254 = vmatpush.bf16.msrb.mxu1 %v1415_v8  ;;  %273 = vmatpush.bf16.msrb.mxu2 %v1462_v48 }
  0x11   :  { %332 = vmatpush.bf16.msrb.mxu3 %v1473_v52 }
  0x13   :  { %802 = vmatpush.bf16.msra.mxu0 %v1485_v56 }
  0x14   :  { %385 = vmatpush.bf16.msra.mxu1 %v1400_v3  ;;  %274 = vmatpush.bf16.msrb.mxu2 %v1485_v56 }
  0x15   :  { %333 = vmatpush.bf16.msrb.mxu3 %v1489_v57 }
  0x18   :  { %386 = vmatpush.bf16.msra.mxu1 %v1415_v8  ;;  %405 = vmatpush.bf16.msra.mxu2 %v1462_v48 }
  0x1c   :  { %406 = vmatpush.bf16.msra.mxu2 %v1485_v56 }
  0x83   :  { %v66_v13 = vpop.f32.mrf.mxu0 }
  0x84   :  { %v67_v14 = vadd.f32 %v1429_v12, %v66_v13 }
  0x88   :  { %v130_v18 = vpop.f32.mrf.mxu1 }
  0x89   :  { %v134_v19 = vadd.f32 %v130_v18, %v67_v14 }
  0x8b   :  { %v148_v20 = vmul.f32 %v134_v19, %v1438_v17  ;;  %v69_v0 = vpop.f32.mrf.mxu0 }
  0x8c   :  { %v70_v1 = vadd.f32 %v1429_v12, %v69_v0 }
  0x8d   :  { %v1224_v21 = vmul.f32 -1.442695, %v148_v20 }
  0x8f   :  { %1273 = vpow2.f32 %v1224_v21 }
  0x90   :  { %v132_v22 = vpop.f32.mrf.mxu1 }
  0x92   :  { %v144_v61 = vpop.f32.mrf.mxu2 }
  0x93   :  { %v145_v6 = vadd.f32 %v1513_v2, %v144_v61 }
  0x95   :  { %v1274_v23 = vpop.eup %1273 }
  0x96   :  { %v152_v24 = vadd.f32 1.0, %v1274_v23 }
  0x98   :  { %1275 = vrcp.f32 %v152_v24  ;;  %v164_v28 = vand.u32 2147483648, %v152_v24  ;;  %v162_v30 = vand.u32 2147483647, %v152_v24  ;;  %vm158_vm5 = vweird.f32 %v152_v24 }
  0x9a   :  { %v165_v32 = vor.u32 1.1754944e-38, %v164_v28  ;;  %vm163_vm7 = vcmp.eq.f32.partialorder %v162_v30, 8.507059e+37  ;;  %v146_v63 = vpop.f32.mrf.mxu2 }
  0x9e   :  { %v1276_v25 = vpop.eup %1275 }
  0x9f   :  { %v154_v26 = vmul.f32 %v1276_v25, %v152_v24  ;;  %vm159_vm4 = vweird.f32 %v1276_v25 }
  0xa0   :  { %vm160_vm6 = vmor %vm158_vm5, %vm159_vm4 }
  0xa1   :  { %v155_v27 = vsub.f32 1.0, %v154_v26 }
  0xa3   :  { %v156_v29 = vmul.f32 %v1276_v25, %v155_v27 }
  0xa5   :  { %v157_v31 = vadd.f32 %v1276_v25, %v156_v29 }
  0xa7   :  { %v161_v33 = vsel %vm160_vm6, %v1276_v25, %v157_v31 }
  0xa8   :  { %v166_v36 = vsel %vm163_vm7, %v165_v32, %v161_v33 }
  0xa9   :  { %v168_v37 = vmul.f32 %v166_v36, %v1438_v17 }
  0xab   :  { %v169_v38 = vadd.f32 %v168_v37, %v1443_v35 }
  0xad   :  { %172 = vrot.lane.b32.xlu0 %v169_v38, %s1374_s25  ;;  %v170_v41 = vmul.f32 0.0, %v169_v38 }
 0x11f   :  { %v173_v39 = vpop.permute.xlu0 %172 }
 0x120   :  { %v175_v40 = vmul.f32 %v173_v39, %v169_v38 }
 0x122   :  { %177 = vrot.lane.b32.xlu0 %v175_v40, %s1375_s26 }
 0x194   :  { %v178_v42 = vpop.permute.xlu0 %177 }
 0x195   :  { %v1449_v43 = vadd.f32 %v178_v42, %v170_v41 }
 0x197   :  { %1277 = vtanh.f32 %v1449_v43 }
 0x19d   :  { %v1278_v44 = vpop.eup %1277 }
 0x19e   :  { %183 = vrot.lane.b32.xlu1 %v1278_v44, %s1374_s25 }
 0x210   :  { %v184_v58 = vpop.permute.xlu1 %183 }
 0x211   :  { %v186_v59 = vmul.f32 %v184_v58, %v169_v38 }
 0x213   :  { %v187_v60 = vpack.c.bf16 %v186_v59, %v186_v59 }
 0x215   :  { %189 = vrot.lane.b32.xlu1 %v187_v60, %s1375_s26 }
 0x287   :  { %v190_v62 = vpop.permute.xlu1 %189 }
 0x288   :  { %1225 = vmatmul.msk.bf16.vlgmr.msra.gmra.mxu3 %vm117_vm8, %v190_v62  ;;  %1227 = vmatmul.msk.bf16.vlgmr.msrb.gmra.mxu1 %vm117_vm8, %v190_v62 }
 0x289   :  { %517 = vmatpush.bf16.msrb.mxu1 %v1400_v3  ;;  %464 = vmatpush.bf16.msra.mxu3 %v1473_v52 }
 0x28d   :  { %518 = vmatpush.bf16.msrb.mxu1 %v1415_v8  ;;  %465 = vmatpush.bf16.msra.mxu3 %v1489_v57 }
 0x305   :  { %v256_v4 = vpop.f32.mrf.mxu1 }
 0x306   :  { %v260_v5 = vadd.f32 %v256_v4, %v70_v1 }
 0x308   :  { %v280_v7 = vmul.f32 %v260_v5, %v1438_v17 }
 0x30a   :  { %v1229_v9 = vmul.f32 -1.442695, %v280_v7 }
 0x30b   :  { %v203_v10 = vpop.f32.mrf.mxu3 }
 0x30c   :  { %1279 = vpow2.f32 %v1229_v9  ;;  %v204_v11 = vadd.f32 %v203_v10, %v145_v6 }
 0x30d   :  { %v258_v13 = vpop.f32.mrf.mxu1 }
 0x30e   :  { %v207_v14 = vmul.f32 %v204_v11, %v1438_v17 }
 0x310   :  { %v1226_v15 = vmul.f32 -1.442695, %v207_v14 }
 0x312   :  { %v1280_v16 = vpop.eup %1279  ;;  %1281 = vpow2.f32 %v1226_v15 }
 0x313   :  { %v284_v18 = vadd.f32 1.0, %v1280_v16  ;;  %v205_v19 = vpop.f32.mrf.mxu3 }
 0x315   :  { %1283 = vrcp.f32 %v284_v18  ;;  %v296_v36 = vand.u32 2147483648, %v284_v18  ;;  %vm290_vm14 = vweird.f32 %v284_v18  ;;  %v294_v38 = vand.u32 2147483647, %v284_v18 }
 0x317   :  { %v297_v42 = vor.u32 1.1754944e-38, %v296_v36  ;;  %vm295_vm1 = vcmp.eq.f32.partialorder %v294_v38, 8.507059e+37 }
 0x318   :  { %v1282_v20 = vpop.eup %1281 }
 0x319   :  { %v211_v21 = vadd.f32 1.0, %v1282_v20 }
 0x31b   :  { %v1284_v22 = vpop.eup %1283  ;;  %1285 = vrcp.f32 %v211_v21  ;;  %v223_v29 = vand.u32 2147483648, %v211_v21  ;;  %v221_v31 = vand.u32 2147483647, %v211_v21  ;;  %vm217_vm10 = vweird.f32 %v211_v21 }
 0x31c   :  { %v286_v23 = vmul.f32 %v1284_v22, %v284_v18  ;;  %vm291_vm11 = vweird.f32 %v1284_v22 }
 0x31d   :  { %v224_v34 = vor.u32 1.1754944e-38, %v223_v29  ;;  %vm222_vm13 = vcmp.eq.f32.partialorder %v221_v31, 8.507059e+37  ;;  %vm292_vm15 = vmor %vm290_vm14, %vm291_vm11 }
 0x31e   :  { %v287_v24 = vsub.f32 1.0, %v286_v23 }
 0x320   :  { %v288_v28 = vmul.f32 %v1284_v22, %v287_v24 }
 0x321   :  { %v1286_v25 = vpop.eup %1285 }
 0x322   :  { %v213_v26 = vmul.f32 %v1286_v25, %v211_v21  ;;  %vm218_vm9 = vweird.f32 %v1286_v25  ;;  %v289_v33 = vadd.f32 %v1284_v22, %v288_v28 }
 0x323   :  { %vm219_vm12 = vmor %vm217_vm10, %vm218_vm9 }
 0x324   :  { %v214_v27 = vsub.f32 1.0, %v213_v26  ;;  %v293_v41 = vsel %vm292_vm15, %v1284_v22, %v289_v33 }
 0x325   :  { %v298_v45 = vsel %vm295_vm1, %v297_v42, %v293_v41 }
 0x326   :  { %v215_v30 = vmul.f32 %v1286_v25, %v214_v27  ;;  %v300_v46 = vmul.f32 %v298_v45, %v1438_v17 }
 0x328   :  { %v216_v32 = vadd.f32 %v1286_v25, %v215_v30  ;;  %v301_v47 = vadd.f32 %v300_v46, %v1443_v35 }
 0x32a   :  { %v220_v37 = vsel %vm219_vm12, %v1286_v25, %v216_v32  ;;  %v302_v59 = vmul.f32 %v301_v47, %v1449_v43  ;;  %v17_v43 = vld [vmem:[%s1796_s0 + $0x10] sm:$0xff] }
 0x32b   :  { %v225_v39 = vsel %vm222_vm13, %v224_v34, %v220_v37  ;;  %1218 = vmatmul.msk.f32.gmra.mxu0 %vm24_vm0, %v17_v43 }
 0x32c   :  { %v227_v40 = vmul.f32 %v225_v39, %v1438_v17 }
 0x32e   :  { %v228_v44 = vadd.f32 %v227_v40, %v1443_v35 }
 0x330   :  { %231 = vrot.lane.b32.xlu2 %v228_v44, %s1374_s25  ;;  %v229_v54 = vmul.f32 0.0, %v228_v44 }
 0x338   :  { %304 = vrot.lane.b32.xlu2 %v301_v47, %s1374_s25 }
 0x38a   :  { %v232_v49 = vpop.permute.xlu2 %231 }
 0x38b   :  { %v234_v50 = vmul.f32 %v232_v49, %v228_v44 }
 0x38d   :  { %236 = vrot.lane.b32.xlu0 %v234_v50, %s1375_s26 }
 0x392   :  { %v305_v51 = vpop.permute.xlu2 %304 }
 0x393   :  { %v307_v53 = vmul.f32 %v305_v51, %v301_v47 }
 0x395   :  { %309 = vrot.lane.b32.xlu1 %v307_v53, %s1375_s26 }
 0x3a8   :  { %v72_v11 = vpop.f32.mrf.mxu0 }
 0x3a9   :  { %v73_v13 = vadd.f32 %v1429_v12, %v72_v11 }
 0x3ff   :  { %v237_v55 = vpop.permute.xlu0 %236 }
 0x400   :  { %v1526_v58 = vadd.f32 %v237_v55, %v229_v54 }
 0x402   :  { %1287 = vtanh.f32 %v1526_v58 }
 0x407   :  { %v310_v60 = vpop.permute.xlu1 %309 }
 0x408   :  { %v1288_v61 = vpop.eup %1287  ;;  %v1530_v62 = vadd.f32 %v310_v60, %v302_v59 }
 0x409   :  { %242 = vrot.lane.b32.xlu2 %v1288_v61, %s1374_s25 }
 0x40a   :  { %1289 = vtanh.f32 %v1530_v62 }
 0x410   :  { %v1290_v63 = vpop.eup %1289 }
 0x411   :  { %315 = vrot.lane.b32.xlu0 %v1290_v63, %s1374_s25 }
 0x463   :  { %v243_v0 = vpop.permute.xlu2 %242 }
 0x464   :  { %v245_v1 = vmul.f32 %v243_v0, %v228_v44 }
 0x466   :  { %v246_v4 = vpack.c.bf16 %v245_v1, %v245_v1 }
 0x468   :  { %262 = vrot.lane.b32.xlu1 %v246_v4, %s1375_s26 }
 0x483   :  { %v316_v5 = vpop.permute.xlu0 %315 }
 0x484   :  { %v318_v6 = vmul.f32 %v316_v5, %v301_v47 }
 0x486   :  { %v319_v7 = vpack.c.bf16 %v318_v6, %v318_v6 }
 0x488   :  { %321 = vrot.lane.b32.xlu2 %v319_v7, %s1375_s26 }
 0x4da   :  { %v263_v9 = vpop.permute.xlu1 %262 }
 0x4db   :  { %1228 = vmatmul.msk.bf16.vlgmr.msrb.gmra.mxu2 %vm117_vm8, %v263_v9 }
 0x4dc   :  { %537 = vmatpush.bf16.msrb.mxu2 %v1462_v48 }
 0x4e0   :  { %538 = vmatpush.bf16.msrb.mxu2 %v1485_v56 }
 0x4e2   :  { %v322_v10 = vpop.permute.xlu2 %321 }
 0x4e3   :  { %1230 = vmatmul.msk.bf16.vlgmr.msrb.gmra.mxu3 %vm117_vm8, %v322_v10  ;;  %1232 = vmatmul.msk.bf16.vlgmr.msra.gmra.mxu1 %vm117_vm8, %v322_v10 }
 0x4e4   :  { %596 = vmatpush.bf16.msrb.mxu3 %v1473_v52  ;;  %669 = vmatpush.bf16.msra.mxu1 %v1462_v48 }
 0x4e8   :  { %597 = vmatpush.bf16.msrb.mxu3 %v1489_v57  ;;  %670 = vmatpush.bf16.msra.mxu1 %v1485_v56 }
 0x55e   :  { %v276_v14 = vpop.f32.mrf.mxu2 }
 0x55f   :  { %v277_v19 = vadd.f32 %v1513_v2, %v276_v14 }
 0x560   :  { %v388_v15 = vpop.f32.mrf.mxu1 }
 0x561   :  { %v392_v16 = vadd.f32 %v388_v15, %v73_v13 }
 0x563   :  { %v412_v18 = vmul.f32 %v392_v16, %v1438_v17 }
 0x565   :  { %v1234_v20 = vmul.f32 -1.442695, %v412_v18 }
 0x566   :  { %v278_v21 = vpop.f32.mrf.mxu2  ;;  %v335_v22 = vpop.f32.mrf.mxu3 }
 0x567   :  { %1291 = vpow2.f32 %v1234_v20  ;;  %v336_v23 = vadd.f32 %v335_v22, %v277_v19 }
 0x568   :  { %v390_v24 = vpop.f32.mrf.mxu1 }
 0x569   :  { %v339_v25 = vmul.f32 %v336_v23, %v1438_v17 }
 0x56b   :  { %v1231_v26 = vmul.f32 -1.442695, %v339_v25 }
 0x56d   :  { %v1292_v27 = vpop.eup %1291  ;;  %1293 = vpow2.f32 %v1231_v26 }
 0x56e   :  { %v416_v28 = vadd.f32 1.0, %v1292_v27  ;;  %v337_v29 = vpop.f32.mrf.mxu3 }
 0x570   :  { %1295 = vrcp.f32 %v416_v28  ;;  %v428_v36 = vand.u32 2147483648, %v416_v28  ;;  %v426_v38 = vand.u32 2147483647, %v416_v28  ;;  %vm422_vm3 = vweird.f32 %v416_v28 }
 0x572   :  { %v429_v42 = vor.u32 1.1754944e-38, %v428_v36  ;;  %vm427_vm5 = vcmp.eq.f32.partialorder %v426_v38, 8.507059e+37 }
 0x573   :  { %v1294_v30 = vpop.eup %1293 }
 0x574   :  { %v343_v31 = vadd.f32 1.0, %v1294_v30 }
 0x576   :  { %v1296_v32 = vpop.eup %1295  ;;  %1297 = vrcp.f32 %v343_v31  ;;  %v355_v47 = vand.u32 2147483648, %v343_v31  ;;  %v353_v51 = vand.u32 2147483647, %v343_v31  ;;  %vm349_vm7 = vweird.f32 %v343_v31 }
 0x577   :  { %v418_v33 = vmul.f32 %v1296_v32, %v416_v28  ;;  %vm423_vm2 = vweird.f32 %v1296_v32 }
 0x578   :  { %vm424_vm4 = vmor %vm422_vm3, %vm423_vm2  ;;  %v356_v55 = vor.u32 1.1754944e-38, %v355_v47  ;;  %vm354_vm10 = vcmp.eq.f32.partialorder %v353_v51, 8.507059e+37 }
 0x579   :  { %v419_v34 = vsub.f32 1.0, %v418_v33 }
 0x57b   :  { %v420_v37 = vmul.f32 %v1296_v32, %v419_v34 }
 0x57c   :  { %v1298_v39 = vpop.eup %1297 }
 0x57d   :  { %v345_v40 = vmul.f32 %v1298_v39, %v343_v31  ;;  %v421_v41 = vadd.f32 %v1296_v32, %v420_v37  ;;  %vm350_vm6 = vweird.f32 %v1298_v39 }
 0x57e   :  { %vm351_vm9 = vmor %vm349_vm7, %vm350_vm6 }
 0x57f   :  { %v346_v44 = vsub.f32 1.0, %v345_v40  ;;  %v425_v45 = vsel %vm424_vm4, %v1296_v32, %v421_v41 }
 0x580   :  { %v430_v46 = vsel %vm427_vm5, %v429_v42, %v425_v45 }
 0x581   :  { %v432_v49 = vmul.f32 %v430_v46, %v1438_v17  ;;  %v347_v50 = vmul.f32 %v1298_v39, %v346_v44 }
 0x583   :  { %v433_v53 = vadd.f32 %v432_v49, %v1443_v35  ;;  %v348_v54 = vadd.f32 %v1298_v39, %v347_v50 }
 0x585   :  { %436 = vrot.lane.b32.xlu1 %v433_v53, %s1374_s25  ;;  %v352_v59 = vsel %vm351_vm9, %v1298_v39, %v348_v54  ;;  %v434_v10 = vmul.f32 %v433_v53, %v1530_v62 }
 0x586   :  { %v357_v60 = vsel %vm354_vm10, %v356_v55, %v352_v59 }
 0x587   :  { %v359_v61 = vmul.f32 %v357_v60, %v1438_v17 }
 0x589   :  { %v360_v63 = vadd.f32 %v359_v61, %v1443_v35 }
 0x58b   :  { %363 = vrot.lane.b32.xlu0 %v360_v63, %s1374_s25  ;;  %v361_v6 = vmul.f32 %v360_v63, %v1526_v58  ;;  %v18_v58 = vld [vmem:[%s1796_s0 + $0x18] sm:$0xff] }
 0x58c   :  { %1219 = vmatmul.msk.f32.gmra.mxu0 %vm24_vm0, %v18_v58 }
 0x5f7   :  { %v437_v0 = vpop.permute.xlu1 %436 }
 0x5f8   :  { %v439_v1 = vmul.f32 %v437_v0, %v433_v53 }
 0x5fa   :  { %441 = vrot.lane.b32.xlu0 %v439_v1, %s1375_s26 }
 0x5fd   :  { %v364_v4 = vpop.permute.xlu0 %363 }
 0x5fe   :  { %v366_v5 = vmul.f32 %v364_v4, %v360_v63 }
 0x600   :  { %368 = vrot.lane.b32.xlu2 %v366_v5, %s1375_s26 }
 0x609   :  { %v75_v23 = vpop.f32.mrf.mxu0 }
 0x60a   :  { %v76_v24 = vadd.f32 %v1429_v12, %v75_v23 }
 0x65a   :  { %v369_v7 = vpop.permute.xlu2 %368 }
 0x65b   :  { %v1563_v43 = vadd.f32 %v369_v7, %v361_v6 }
 0x65d   :  { %1299 = vtanh.f32 %v1563_v43 }
 0x663   :  { %v1300_v9 = vpop.eup %1299 }
 0x664   :  { %374 = vrot.lane.b32.xlu1 %v1300_v9, %s1374_s25 }
 0x66c   :  { %v442_v11 = vpop.permute.xlu0 %441 }
 0x66d   :  { %v1568_v13 = vadd.f32 %v442_v11, %v434_v10 }
 0x66f   :  { %1301 = vtanh.f32 %v1568_v13 }
 0x675   :  { %v1302_v14 = vpop.eup %1301 }
 0x676   :  { %447 = vrot.lane.b32.xlu2 %v1302_v14, %s1374_s25 }
 0x6d0   :  { %v448_v15 = vpop.permute.xlu2 %447 }
 0x6d1   :  { %v450_v16 = vmul.f32 %v448_v15, %v433_v53 }
 0x6d3   :  { %v451_v18 = vpack.c.bf16 %v450_v16, %v450_v16 }
 0x6d5   :  { %453 = vrot.lane.b32.xlu1 %v451_v18, %s1375_s26 }
 0x6d6   :  { %v375_v62 = vpop.permute.xlu1 %374 }
 0x6d7   :  { %v377_v19 = vmul.f32 %v375_v62, %v360_v63 }
 0x6d9   :  { %v378_v20 = vpack.c.bf16 %v377_v19, %v377_v19 }
 0x6db   :  { %394 = vrot.lane.b32.xlu0 %v378_v20, %s1375_s26 }
 0x747   :  { %v454_v21 = vpop.permute.xlu1 %453 }
 0x748   :  { %1235 = vmatmul.msk.bf16.vlgmr.msra.gmra.mxu3 %vm117_vm8, %v454_v21  ;;  %1237 = vmatmul.msk.bf16.vlgmr.msrb.gmra.mxu1 %vm117_vm8, %v454_v21 }
 0x749   :  { %781 = vmatpush.bf16.msra.mxu3 %v1400_v3  ;;  %860 = vmatpush.bf16.msrb.mxu1 %v1473_v52 }
 0x74d   :  { %v395_v22 = vpop.permute.xlu0 %394  ;;  %782 = vmatpush.bf16.msra.mxu3 %v1415_v8  ;;  %861 = vmatpush.bf16.msrb.mxu1 %v1489_v57 }
 0x74e   :  { %1233 = vmatmul.msk.bf16.vlgmr.msra.gmra.mxu2 %vm117_vm8, %v395_v22 }
 0x74f   :  { %728 = vmatpush.bf16.msra.mxu2 %v1473_v52 }
 0x753   :  { %729 = vmatpush.bf16.msra.mxu2 %v1489_v57 }
 0x7c5   :  { %v520_v25 = vpop.f32.mrf.mxu1 }
 0x7c6   :  { %v524_v26 = vadd.f32 %v520_v25, %v76_v24 }
 0x7c8   :  { %v544_v27 = vmul.f32 %v524_v26, %v1438_v17  ;;  %v20_v26 = vld [vmem:[%s1796_s0 + $0x28] sm:$0xff] }
 0x7ca   :  { %v1239_v28 = vmul.f32 -1.442695, %v544_v27 }
 0x7cb   :  { %v467_v29 = vpop.f32.mrf.mxu3 }
 0x7cc   :  { %1303 = vpow2.f32 %v1239_v28  ;;  %v21_v28 = vld [vmem:[%s1796_s0 + $0x30] sm:$0xff] }
 0x7cd   :  { %v522_v30 = vpop.f32.mrf.mxu1 }
 0x7d1   :  { %v408_v31 = vpop.f32.mrf.mxu2 }
 0x7d2   :  { %v1304_v32 = vpop.eup %1303  ;;  %v409_v33 = vadd.f32 %v1513_v2, %v408_v31 }
 0x7d3   :  { %v548_v34 = vadd.f32 1.0, %v1304_v32  ;;  %v469_v36 = vpop.f32.mrf.mxu3 }
 0x7d4   :  { %v468_v37 = vadd.f32 %v467_v29, %v409_v33  ;;  %v22_v33 = vld [vmem:[%s1796_s0 + $0x38] sm:$0xff] }
 0x7d5   :  { %1305 = vrcp.f32 %v548_v34  ;;  %v560_v45 = vand.u32 2147483648, %v548_v34  ;;  %v558_v49 = vand.u32 2147483647, %v548_v34  ;;  %vm554_vm12 = vweird.f32 %v548_v34 }
 0x7d6   :  { %v471_v38 = vmul.f32 %v468_v37, %v1438_v17 }
 0x7d7   :  { %v561_v53 = vor.u32 1.1754944e-38, %v560_v45  ;;  %vm559_vm14 = vcmp.eq.f32.partialorder %v558_v49, 8.507059e+37 }
 0x7d8   :  { %v1236_v39 = vmul.f32 -1.442695, %v471_v38 }
 0x7d9   :  { %v410_v40 = vpop.f32.mrf.mxu2 }
 0x7da   :  { %1307 = vpow2.f32 %v1236_v39 }
 0x7db   :  { %v1306_v41 = vpop.eup %1305 }
 0x7dc   :  { %v550_v42 = vmul.f32 %v1306_v41, %v548_v34  ;;  %vm555_vm11 = vweird.f32 %v1306_v41 }
 0x7dd   :  { %vm556_vm13 = vmor %vm554_vm12, %vm555_vm11 }
 0x7de   :  { %v551_v44 = vsub.f32 1.0, %v550_v42 }
 0x7e0   :  { %v1308_v46 = vpop.eup %1307  ;;  %v552_v47 = vmul.f32 %v1306_v41, %v551_v44 }
 0x7e1   :  { %v475_v50 = vadd.f32 1.0, %v1308_v46 }
 0x7e2   :  { %v553_v51 = vadd.f32 %v1306_v41, %v552_v47 }
 0x7e3   :  { %1309 = vrcp.f32 %v475_v50  ;;  %v487_v1 = vand.u32 2147483648, %v475_v50  ;;  %v485_v5 = vand.u32 2147483647, %v475_v50  ;;  %vm481_vm1 = vweird.f32 %v475_v50 }
 0x7e4   :  { %v557_v54 = vsel %vm556_vm13, %v1306_v41, %v553_v51 }
 0x7e5   :  { %v562_v55 = vsel %vm559_vm14, %v561_v53, %v557_v54  ;;  %v488_v7 = vor.u32 1.1754944e-38, %v487_v1  ;;  %vm486_vm3 = vcmp.eq.f32.partialorder %v485_v5, 8.507059e+37 }
 0x7e6   :  { %v564_v59 = vmul.f32 %v562_v55, %v1438_v17 }
 0x7e8   :  { %v565_v60 = vadd.f32 %v564_v59, %v1443_v35 }
 0x7e9   :  { %v1310_v61 = vpop.eup %1309 }
 0x7ea   :  { %v477_v63 = vmul.f32 %v1310_v61, %v475_v50  ;;  %568 = vrot.lane.b32.xlu0 %v565_v60, %s1374_s25  ;;  %vm482_vm15 = vweird.f32 %v1310_v61  ;;  %v566_v62 = vmul.f32 %v565_v60, %v1568_v13  ;;  %v19_v13 = vld [vmem:[%s1796_s0 + $0x20] sm:$0xff] }
 0x7eb   :  { %vm483_vm2 = vmor %vm481_vm1, %vm482_vm15  ;;  %1220 = vmatmul.msk.f32.gmra.mxu0 %vm24_vm0, %v19_v13 }
 0x7ec   :  { %v478_v0 = vsub.f32 1.0, %v477_v63 }
 0x7ee   :  { %v479_v4 = vmul.f32 %v1310_v61, %v478_v0 }
 0x7f0   :  { %v480_v6 = vadd.f32 %v1310_v61, %v479_v4 }
 0x7f2   :  { %v484_v9 = vsel %vm483_vm2, %v1310_v61, %v480_v6 }
 0x7f3   :  { %v489_v10 = vsel %vm486_vm3, %v488_v7, %v484_v9  ;;  %1221 = vmatmul.msk.f32.gmra.mxu0 %vm24_vm0, %v20_v26 }
 0x7f4   :  { %v491_v11 = vmul.f32 %v489_v10, %v1438_v17 }
 0x7f6   :  { %v492_v14 = vadd.f32 %v491_v11, %v1443_v35 }
 0x7f8   :  { %495 = vrot.lane.b32.xlu2 %v492_v14, %s1374_s25  ;;  %v493_v22 = vmul.f32 %v492_v14, %v1563_v43 }
 0x7fb   :  { %1222 = vmatmul.msk.f32.gmra.mxu0 %vm24_vm0, %v21_v28 }
 0x803   :  { %1223 = vmatmul.msk.f32.gmra.mxu0 %vm24_vm0, %v22_v33 }
 0x852   :  { %v496_v58 = vpop.permute.xlu2 %495 }
 0x853   :  { %v498_v15 = vmul.f32 %v496_v58, %v492_v14 }
 0x855   :  { %500 = vrot.lane.b32.xlu1 %v498_v15, %s1375_s26 }
 0x85c   :  { %v569_v16 = vpop.permute.xlu0 %568 }
 0x85d   :  { %v571_v18 = vmul.f32 %v569_v16, %v565_v60 }
 0x85f   :  { %573 = vrot.lane.b32.xlu2 %v571_v18, %s1375_s26 }
 0x868   :  { %v78_v37 = vpop.f32.mrf.mxu0 }
 0x869   :  { %v79_v42 = vadd.f32 %v1429_v12, %v78_v37 }
 0x870   :  { %v1636_v38 = vpop.f32.mrf.mxu0 }
 0x878   :  { %v1638_v39 = vpop.f32.mrf.mxu0 }
 0x880   :  { %v1640_v40 = vpop.f32.mrf.mxu0 }
 0x8b9   :  { %v574_v19 = vpop.permute.xlu2 %573 }
 0x8ba   :  { %v1600_v20 = vadd.f32 %v574_v19, %v566_v62 }
 0x8bc   :  { %1311 = vtanh.f32 %v1600_v20 }
 0x8c2   :  { %v1312_v21 = vpop.eup %1311 }
 0x8c3   :  { %579 = vrot.lane.b32.xlu1 %v1312_v21, %s1374_s25 }
 0x8c7   :  { %v501_v23 = vpop.permute.xlu1 %500 }
 0x8c8   :  { %v1605_v24 = vadd.f32 %v501_v23, %v493_v22 }
 0x8ca   :  { %1313 = vtanh.f32 %v1605_v24 }
 0x8d0   :  { %v1314_v25 = vpop.eup %1313 }
 0x8d1   :  { %506 = vrot.lane.b32.xlu0 %v1314_v25, %s1374_s25 }
 0x935   :  { %v580_v43 = vpop.permute.xlu1 %579 }
 0x936   :  { %v582_v27 = vmul.f32 %v580_v43, %v565_v60 }
 0x938   :  { %v583_v29 = vpack.c.bf16 %v582_v27, %v582_v27 }
 0x93a   :  { %585 = vrot.lane.b32.xlu0 %v583_v29, %s1375_s26 }
 0x943   :  { %v507_v30 = vpop.permute.xlu0 %506 }
 0x944   :  { %v509_v31 = vmul.f32 %v507_v30, %v492_v14 }
 0x946   :  { %v510_v32 = vpack.c.bf16 %v509_v31, %v509_v31 }
 0x948   :  { %526 = vrot.lane.b32.xlu2 %v510_v32, %s1375_s26 }
 0x9a2   :  { %v527_v34 = vpop.permute.xlu2 %526 }
 0x9a3   :  { %1238 = vmatmul.msk.bf16.vlgmr.msrb.gmra.mxu2 %vm117_vm8, %v527_v34 }
 0x9a4   :  { %913 = vmatpush.bf16.msrb.mxu2 %v1400_v3 }
 0x9a8   :  { %914 = vmatpush.bf16.msrb.mxu2 %v1415_v8 }
 0x9ac   :  { %v586_v36 = vpop.permute.xlu0 %585 }
 0x9ad   :  { %1240 = vmatmul.msk.bf16.vlgmr.msrb.gmra.mxu3 %vm117_vm8, %v586_v36  ;;  %1242 = vmatmul.msk.bf16.vlgmr.msrb.gmra.mxu0 %vm117_vm8, %v586_v36 }
 0x9ae   :  { %933 = vmatpush.bf16.msrb.mxu3 %v1462_v48  ;;  %992 = vmatpush.bf16.msrb.mxu0 %v1473_v52 }
 0x9b2   :  { %934 = vmatpush.bf16.msrb.mxu3 %v1485_v56  ;;  %993 = vmatpush.bf16.msrb.mxu0 %v1489_v57 }
 0xa26   :  { %v540_v41 = vpop.f32.mrf.mxu2 }
 0xa27   :  { %v541_v49 = vadd.f32 %v1513_v2, %v540_v41 }
 0xa2a   :  { %v652_v44 = vpop.f32.mrf.mxu0 }
 0xa2b   :  { %v656_v45 = vadd.f32 %v652_v44, %v79_v42 }
 0xa2d   :  { %v676_v46 = vmul.f32 %v656_v45, %v1438_v17 }
 0xa2e   :  { %v542_v47 = vpop.f32.mrf.mxu2 }
 0xa2f   :  { %v1244_v50 = vmul.f32 -1.442695, %v676_v46 }
 0xa30   :  { %v599_v51 = vpop.f32.mrf.mxu3 }
 0xa31   :  { %1315 = vpow2.f32 %v1244_v50  ;;  %v600_v53 = vadd.f32 %v599_v51, %v541_v49 }
 0xa32   :  { %v654_v54 = vpop.f32.mrf.mxu0 }
 0xa33   :  { %v603_v55 = vmul.f32 %v600_v53, %v1438_v17 }
 0xa35   :  { %v1241_v59 = vmul.f32 -1.442695, %v603_v55 }
 0xa37   :  { %v1316_v60 = vpop.eup %1315  ;;  %1317 = vpow2.f32 %v1241_v59 }
 0xa38   :  { %v680_v61 = vadd.f32 1.0, %v1316_v60  ;;  %v601_v63 = vpop.f32.mrf.mxu3 }
 0xa3a   :  { %1319 = vrcp.f32 %v680_v61  ;;  %v692_v7 = vand.u32 2147483648, %v680_v61  ;;  %v690_v10 = vand.u32 2147483647, %v680_v61  ;;  %vm686_vm4 = vweird.f32 %v680_v61 }
 0xa3c   :  { %v693_v15 = vor.u32 1.1754944e-38, %v692_v7  ;;  %vm691_vm6 = vcmp.eq.f32.partialorder %v690_v10, 8.507059e+37 }
 0xa3d   :  { %v1318_v0 = vpop.eup %1317 }
 0xa3e   :  { %v607_v1 = vadd.f32 1.0, %v1318_v0 }
 0xa40   :  { %v1320_v4 = vpop.eup %1319  ;;  %1321 = vrcp.f32 %v607_v1  ;;  %v619_v19 = vand.u32 2147483648, %v607_v1  ;;  %v617_v23 = vand.u32 2147483647, %v607_v1  ;;  %vm613_vm9 = vweird.f32 %v607_v1 }
 0xa41   :  { %v682_v5 = vmul.f32 %v1320_v4, %v680_v61  ;;  %vm687_vm0 = vweird.f32 %v1320_v4 }
 0xa42   :  { %vm688_vm5 = vmor %vm686_vm4, %vm687_vm0  ;;  %v620_v26 = vor.u32 1.1754944e-38, %v619_v19  ;;  %vm618_vm11 = vcmp.eq.f32.partialorder %v617_v23, 8.507059e+37 }
 0xa43   :  { %v683_v6 = vsub.f32 1.0, %v682_v5 }
 0xa45   :  { %v684_v9 = vmul.f32 %v1320_v4, %v683_v6 }
 0xa46   :  { %v1322_v11 = vpop.eup %1321 }
 0xa47   :  { %v609_v14 = vmul.f32 %v1322_v11, %v607_v1  ;;  %v685_v58 = vadd.f32 %v1320_v4, %v684_v9  ;;  %vm614_vm7 = vweird.f32 %v1322_v11 }
 0xa48   :  { %vm615_vm10 = vmor %vm613_vm9, %vm614_vm7 }
 0xa49   :  { %v610_v16 = vsub.f32 1.0, %v609_v14  ;;  %v689_v18 = vsel %vm688_vm5, %v1320_v4, %v685_v58 }
 0xa4a   :  { %v694_v62 = vsel %vm691_vm6, %v693_v15, %v689_v18 }
 0xa4b   :  { %v696_v21 = vmul.f32 %v694_v62, %v1438_v17  ;;  %v611_v22 = vmul.f32 %v1322_v11, %v610_v16 }
 0xa4d   :  { %v697_v25 = vadd.f32 %v696_v21, %v1443_v35  ;;  %v612_v13 = vadd.f32 %v1322_v11, %v611_v22 }
 0xa4f   :  { %700 = vrot.lane.b32.xlu1 %v697_v25, %s1374_s25  ;;  %v616_v43 = vsel %vm615_vm10, %v1322_v11, %v612_v13  ;;  %v698_v42 = vmul.f32 %v697_v25, %v1600_v20 }
 0xa50   :  { %v621_v27 = vsel %vm618_vm11, %v620_v26, %v616_v43 }
 0xa51   :  { %v623_v28 = vmul.f32 %v621_v27, %v1438_v17 }
 0xa53   :  { %v624_v29 = vadd.f32 %v623_v28, %v1443_v35 }
 0xa55   :  { %627 = vrot.lane.b32.xlu2 %v624_v29, %s1374_s25  ;;  %v625_v34 = vmul.f32 %v624_v29, %v1605_v24 }
 0xaaf   :  { %v628_v30 = vpop.permute.xlu2 %627 }
 0xab0   :  { %v630_v31 = vmul.f32 %v628_v30, %v624_v29 }
 0xab2   :  { %632 = vrot.lane.b32.xlu1 %v630_v31, %s1375_s26 }
 0xac1   :  { %v701_v32 = vpop.permute.xlu1 %700 }
 0xac2   :  { %v703_v33 = vmul.f32 %v701_v32, %v697_v25 }
 0xac4   :  { %705 = vrot.lane.b32.xlu0 %v703_v33, %s1375_s26 }
 0xb24   :  { %v633_v36 = vpop.permute.xlu1 %632 }
 0xb25   :  { %v1655_v37 = vadd.f32 %v633_v36, %v625_v34 }
 0xb27   :  { %1323 = vtanh.f32 %v1655_v37 }
 0xb2d   :  { %v1324_v41 = vpop.eup %1323 }
 0xb2e   :  { %638 = vrot.lane.b32.xlu0 %v1324_v41, %s1374_s25 }
 0xb36   :  { %v706_v44 = vpop.permute.xlu0 %705 }
 0xb37   :  { %v1660_v45 = vadd.f32 %v706_v44, %v698_v42 }
 0xb39   :  { %1325 = vtanh.f32 %v1660_v45 }
 0xb3f   :  { %v1326_v46 = vpop.eup %1325 }
 0xb40   :  { %711 = vrot.lane.b32.xlu2 %v1326_v46, %s1374_s25 }
 0xb9a   :  { %v712_v47 = vpop.permute.xlu2 %711 }
 0xb9b   :  { %v714_v24 = vmul.f32 %v712_v47, %v697_v25 }
 0xb9d   :  { %v715_v49 = vpack.c.bf16 %v714_v24, %v714_v24 }
 0xb9f   :  { %717 = vrot.lane.b32.xlu1 %v715_v49, %s1375_s26 }
 0xba0   :  { %v639_v50 = vpop.permute.xlu0 %638 }
 0xba1   :  { %v641_v51 = vmul.f32 %v639_v50, %v624_v29 }
 0xba3   :  { %v642_v53 = vpack.c.bf16 %v641_v51, %v641_v51 }
 0xba5   :  { %658 = vrot.lane.b32.xlu2 %v642_v53, %s1375_s26 }
 0xbff   :  { %v659_v54 = vpop.permute.xlu2 %658 }
 0xc00   :  { %1243 = vmatmul.msk.bf16.vlgmr.msra.gmra.mxu1 %vm117_vm8, %v659_v54 }
 0xc01   :  { %1045 = vmatpush.bf16.msra.mxu1 %v1400_v3  ;;  %v82_v3 = vadd.f32 %v1429_v12, %v1636_v38 }
 0xc05   :  { %1046 = vmatpush.bf16.msra.mxu1 %v1415_v8 }
 0xc11   :  { %v718_v20 = vpop.permute.xlu1 %717 }
 0xc12   :  { %1245 = vmatmul.msk.bf16.vlgmr.msra.gmra.mxu2 %vm117_vm8, %v718_v20  ;;  %1247 = vmatmul.msk.bf16.vlgmr.msra.gmra.mxu3 %vm117_vm8, %v718_v20 }
 0xc13   :  { %1124 = vmatpush.bf16.msra.mxu3 %v1473_v52  ;;  %1065 = vmatpush.bf16.msra.mxu2 %v1462_v48 }
 0xc17   :  { %1125 = vmatpush.bf16.msra.mxu3 %v1489_v57  ;;  %1066 = vmatpush.bf16.msra.mxu2 %v1485_v56 }
 0xc7d   :  { %v672_v55 = vpop.f32.mrf.mxu1 }
 0xc7e   :  { %v673_v8 = vadd.f32 %v1513_v2, %v672_v55 }
 0xc85   :  { %v674_v59 = vpop.f32.mrf.mxu1 }
 0xc95   :  { %v731_v60 = vpop.f32.mrf.mxu2  ;;  %v784_v61 = vpop.f32.mrf.mxu3 }
 0xc96   :  { %v732_v63 = vadd.f32 %v731_v60, %v673_v8  ;;  %v788_v0 = vadd.f32 %v784_v61, %v82_v3 }
 0xc98   :  { %v735_v1 = vmul.f32 %v732_v63, %v1438_v17  ;;  %v808_v52 = vmul.f32 %v788_v0, %v1438_v17 }
 0xc9a   :  { %v1246_v48 = vmul.f32 -1.442695, %v735_v1  ;;  %v1249_v4 = vmul.f32 -1.442695, %v808_v52  ;;  %v1708_v1 = vld [vmem:[%s1795_s1 + $0x70] ss:$0 sm:$0xff] }
 0xc9b   :  { %v85_v52 = vadd.f32 %v1708_v1, %v1638_v39 }
 0xc9c   :  { %1327 = vpow2.f32 %v1246_v48 }
 0xc9d   :  { %1329 = vpow2.f32 %v1249_v4  ;;  %v733_v56 = vpop.f32.mrf.mxu2  ;;  %v786_v57 = vpop.f32.mrf.mxu3 }
 0xca2   :  { %v1328_v5 = vpop.eup %1327 }
 0xca3   :  { %v1330_v6 = vpop.eup %1329  ;;  %v739_v7 = vadd.f32 1.0, %v1328_v5 }
 0xca4   :  { %v812_v12 = vadd.f32 1.0, %v1330_v6 }
 0xca5   :  { %1331 = vrcp.f32 %v739_v7  ;;  %v751_v15 = vand.u32 2147483648, %v739_v7  ;;  %v749_v62 = vand.u32 2147483647, %v739_v7  ;;  %vm745_vm14 = vweird.f32 %v739_v7 }
 0xca6   :  { %1333 = vrcp.f32 %v812_v12  ;;  %v824_v16 = vand.u32 2147483648, %v812_v12  ;;  %v822_v21 = vand.u32 2147483647, %v812_v12  ;;  %vm818_vm15 = vweird.f32 %v812_v12 }
 0xca7   :  { %v752_v25 = vor.u32 1.1754944e-38, %v751_v15  ;;  %vm750_vm3 = vcmp.eq.f32.partialorder %v749_v62, 8.507059e+37 }
 0xca8   :  { %v825_v13 = vor.u32 1.1754944e-38, %v824_v16  ;;  %vm823_vm0 = vcmp.eq.f32.partialorder %v822_v21, 8.507059e+37 }
 0xcab   :  { %v1332_v38 = vpop.eup %1331 }
 0xcac   :  { %v1334_v9 = vpop.eup %1333  ;;  %v741_v10 = vmul.f32 %v1332_v38, %v739_v7  ;;  %vm746_vm12 = vweird.f32 %v1332_v38 }
 0xcad   :  { %v814_v11 = vmul.f32 %v1334_v9, %v812_v12  ;;  %vm819_vm13 = vweird.f32 %v1334_v9  ;;  %vm747_vm1 = vmor %vm745_vm14, %vm746_vm12 }
 0xcae   :  { %v742_v14 = vsub.f32 1.0, %v741_v10  ;;  %vm820_vm2 = vmor %vm818_vm15, %vm819_vm13 }
 0xcaf   :  { %v815_v58 = vsub.f32 1.0, %v814_v11 }
 0xcb0   :  { %v743_v18 = vmul.f32 %v1332_v38, %v742_v14 }
 0xcb1   :  { %v816_v19 = vmul.f32 %v1334_v9, %v815_v58 }
 0xcb2   :  { %v744_v22 = vadd.f32 %v1332_v38, %v743_v18 }
 0xcb3   :  { %v817_v23 = vadd.f32 %v1334_v9, %v816_v19 }
 0xcb4   :  { %v748_v26 = vsel %vm747_vm1, %v1332_v38, %v744_v22 }
 0xcb5   :  { %v821_v43 = vsel %vm820_vm2, %v1334_v9, %v817_v23  ;;  %v753_v27 = vsel %vm750_vm3, %v752_v25, %v748_v26 }
 0xcb6   :  { %v826_v28 = vsel %vm823_vm0, %v825_v13, %v821_v43  ;;  %v755_v29 = vmul.f32 %v753_v27, %v1438_v17 }
 0xcb7   :  { %v828_v30 = vmul.f32 %v826_v28, %v1438_v17 }
 0xcb8   :  { %v756_v31 = vadd.f32 %v755_v29, %v1443_v35 }
 0xcb9   :  { %v829_v32 = vadd.f32 %v828_v30, %v1443_v35 }
 0xcba   :  { %759 = vrot.lane.b32.xlu0 %v756_v31, %s1374_s25  ;;  %v757_v42 = vmul.f32 %v756_v31, %v1655_v37 }
 0xcbb   :  { %832 = vrot.lane.b32.xlu1 %v829_v32, %s1374_s25  ;;  %v830_v24 = vmul.f32 %v829_v32, %v1660_v45 }
 0xd2c   :  { %v760_v33 = vpop.permute.xlu0 %759 }
 0xd2d   :  { %v833_v34 = vpop.permute.xlu1 %832  ;;  %v762_v36 = vmul.f32 %v760_v33, %v756_v31 }
 0xd2e   :  { %v835_v41 = vmul.f32 %v833_v34, %v829_v32 }
 0xd2f   :  { %764 = vrot.lane.b32.xlu2 %v762_v36, %s1375_s26 }
 0xd30   :  { %837 = vrot.lane.b32.xlu0 %v835_v41, %s1375_s26 }
 0xd89   :  { %v765_v44 = vpop.permute.xlu2 %764 }
 0xd8a   :  { %v1689_v46 = vadd.f32 %v765_v44, %v757_v42 }
 0xd8c   :  { %1335 = vtanh.f32 %v1689_v46 }
 0xd92   :  { %v1336_v47 = vpop.eup %1335 }
 0xd93   :  { %770 = vrot.lane.b32.xlu1 %v1336_v47, %s1374_s25 }
 0xda2   :  { %v838_v49 = vpop.permute.xlu0 %837 }
 0xda3   :  { %v1694_v50 = vadd.f32 %v838_v49, %v830_v24 }
 0xda5   :  { %1337 = vtanh.f32 %v1694_v50 }
 0xdab   :  { %v1338_v51 = vpop.eup %1337 }
 0xdac   :  { %843 = vrot.lane.b32.xlu2 %v1338_v51, %s1374_s25 }
 0xe05   :  { %v771_v53 = vpop.permute.xlu1 %770 }
 0xe06   :  { %v844_v37 = vpop.permute.xlu2 %843  ;;  %v773_v54 = vmul.f32 %v771_v53, %v756_v31 }
 0xe07   :  { %v846_v20 = vmul.f32 %v844_v37, %v829_v32 }
 0xe08   :  { %v774_v55 = vpack.c.bf16 %v773_v54, %v773_v54 }
 0xe09   :  { %v847_v59 = vpack.c.bf16 %v846_v20, %v846_v20 }
 0xe0a   :  { %790 = vrot.lane.b32.xlu0 %v774_v55, %s1375_s26 }
 0xe0b   :  { %849 = vrot.lane.b32.xlu1 %v847_v59, %s1375_s26 }
 0xe7c   :  { %v791_v3 = vpop.permute.xlu0 %790 }
 0xe7d   :  { %v850_v45 = vpop.permute.xlu1 %849  ;;  %1248 = vmatmul.msk.bf16.vlgmr.msra.gmra.mxu0 %vm117_vm8, %v791_v3 }
 0xe7e   :  { %1250 = vmatmul.msk.bf16.vlgmr.msrb.gmra.mxu1 %vm117_vm8, %v850_v45  ;;  %1252 = vmatmul.msk.bf16.vlgmr.msrb.gmra.mxu2 %vm117_vm8, %v850_v45 }
 0xefa   :  { %v804_v8 = vpop.f32.mrf.mxu0 }
 0xefb   :  { %v805_v60 = vadd.f32 %v1513_v2, %v804_v8  ;;  %v863_v61 = vpop.f32.mrf.mxu1 }
 0xefd   :  { %v864_v63 = vadd.f32 %v863_v61, %v805_v60 }
 0xeff   :  { %v867_v0 = vmul.f32 %v864_v63, %v1438_v17 }
 0xf01   :  { %v1251_v48 = vmul.f32 -1.442695, %v867_v0  ;;  %v916_v4 = vpop.f32.mrf.mxu2  ;;  %v88_v0 = vadd.f32 %v1708_v1, %v1640_v40 }
 0xf02   :  { %v920_v56 = vadd.f32 %v916_v4, %v85_v52  ;;  %v806_v57 = vpop.f32.mrf.mxu0  ;;  %v1741_v52 = vld [vmem:[%s1795_s1 + $0x78] ss:$0 sm:$0xff] }
 0xf03   :  { %1339 = vpow2.f32 %v1251_v48  ;;  %v865_v5 = vpop.f32.mrf.mxu1 }
 0xf04   :  { %v940_v2 = vmul.f32 %v920_v56, %v1438_v17 }
 0xf06   :  { %v1254_v6 = vmul.f32 -1.442695, %v940_v2 }
 0xf08   :  { %1341 = vpow2.f32 %v1254_v6 }
 0xf09   :  { %v1340_v7 = vpop.eup %1339  ;;  %v918_v12 = vpop.f32.mrf.mxu2 }
 0xf0a   :  { %v871_v38 = vadd.f32 1.0, %v1340_v7 }
 0xf0c   :  { %1343 = vrcp.f32 %v871_v38  ;;  %v883_v58 = vand.u32 2147483648, %v871_v38  ;;  %v881_v18 = vand.u32 2147483647, %v871_v38  ;;  %vm877_vm5 = vweird.f32 %v871_v38 }
 0xf0e   :  { %v1342_v9 = vpop.eup %1341  ;;  %v884_v22 = vor.u32 1.1754944e-38, %v883_v58  ;;  %vm882_vm7 = vcmp.eq.f32.partialorder %v881_v18, 8.507059e+37 }
 0xf0f   :  { %v944_v10 = vadd.f32 1.0, %v1342_v9 }
 0xf11   :  { %1345 = vrcp.f32 %v944_v10  ;;  %v956_v25 = vand.u32 2147483648, %v944_v10  ;;  %v954_v43 = vand.u32 2147483647, %v944_v10  ;;  %vm950_vm10 = vweird.f32 %v944_v10 }
 0xf12   :  { %v1344_v11 = vpop.eup %1343 }
 0xf13   :  { %v873_v14 = vmul.f32 %v1344_v11, %v871_v38  ;;  %vm878_vm4 = vweird.f32 %v1344_v11  ;;  %v957_v30 = vor.u32 1.1754944e-38, %v956_v25  ;;  %vm955_vm12 = vcmp.eq.f32.partialorder %v954_v43, 8.507059e+37 }
 0xf14   :  { %vm879_vm6 = vmor %vm877_vm5, %vm878_vm4 }
 0xf15   :  { %v874_v39 = vsub.f32 1.0, %v873_v14 }
 0xf17   :  { %v1346_v15 = vpop.eup %1345  ;;  %v875_v16 = vmul.f32 %v1344_v11, %v874_v39 }
 0xf18   :  { %v946_v62 = vmul.f32 %v1346_v15, %v944_v10  ;;  %vm951_vm9 = vweird.f32 %v1346_v15 }
 0xf19   :  { %v876_v19 = vadd.f32 %v1344_v11, %v875_v16  ;;  %vm952_vm11 = vmor %vm950_vm10, %vm951_vm9  ;;  %vm1210_vm10 = vcmask 7168  }
 0xf1a   :  { %v947_v21 = vsub.f32 1.0, %v946_v62 }
 0xf1b   :  { %v880_v23 = vsel %vm879_vm6, %v1344_v11, %v876_v19 }
 0xf1c   :  { %v885_v13 = vsel %vm882_vm7, %v884_v22, %v880_v23  ;;  %v948_v26 = vmul.f32 %v1346_v15, %v947_v21 }
 0xf1d   :  { %v887_v27 = vmul.f32 %v885_v13, %v1438_v17 }
 0xf1e   :  { %v949_v28 = vadd.f32 %v1346_v15, %v948_v26 }
 0xf1f   :  { %v888_v29 = vadd.f32 %v887_v27, %v1443_v35 }
 0xf20   :  { %v953_v31 = vsel %vm952_vm11, %v1346_v15, %v949_v28 }
 0xf21   :  { %891 = vrot.lane.b32.xlu2 %v888_v29, %s1374_s25  ;;  %v958_v32 = vsel %vm955_vm12, %v957_v30, %v953_v31  ;;  %v889_v47 = vmul.f32 %v888_v29, %v1689_v46 }
 0xf22   :  { %v960_v33 = vmul.f32 %v958_v32, %v1438_v17 }
 0xf24   :  { %v961_v34 = vadd.f32 %v960_v33, %v1443_v35 }
 0xf26   :  { %964 = vrot.lane.b32.xlu0 %v961_v34, %s1374_s25  ;;  %v962_v51 = vmul.f32 %v961_v34, %v1694_v50 }
 0xf7b   :  { %v892_v36 = vpop.permute.xlu2 %891 }
 0xf7c   :  { %v894_v41 = vmul.f32 %v892_v36, %v888_v29 }
 0xf7e   :  { %896 = vrot.lane.b32.xlu1 %v894_v41, %s1375_s26 }
 0xf98   :  { %v965_v42 = vpop.permute.xlu0 %964 }
 0xf99   :  { %v967_v44 = vmul.f32 %v965_v42, %v961_v34 }
 0xf9b   :  { %969 = vrot.lane.b32.xlu2 %v967_v44, %s1375_s26 }
 0xff0   :  { %v897_v24 = vpop.permute.xlu1 %896 }
 0xff1   :  { %v1722_v49 = vadd.f32 %v897_v24, %v889_v47 }
 0xff3   :  { %1347 = vtanh.f32 %v1722_v49 }
 0xff5   :  { %v970_v53 = vpop.permute.xlu2 %969 }
 0xff6   :  { %v1726_v37 = vadd.f32 %v970_v53, %v962_v51 }
 0xff8   :  { %1349 = vtanh.f32 %v1726_v37 }
 0xff9   :  { %v1348_v54 = vpop.eup %1347 }
 0xffa   :  { %902 = vrot.lane.b32.xlu0 %v1348_v54, %s1374_s25 }
 0xffe   :  { %v1350_v20 = vpop.eup %1349 }
 0xfff   :  { %975 = vrot.lane.b32.xlu1 %v1350_v20, %s1374_s25 }
0x106c   :  { %v903_v55 = vpop.permute.xlu0 %902 }
0x106d   :  { %v905_v46 = vmul.f32 %v903_v55, %v888_v29 }
0x106f   :  { %v906_v59 = vpack.c.bf16 %v905_v46, %v905_v46 }
0x1071   :  { %v976_v3 = vpop.permute.xlu1 %975  ;;  %922 = vrot.lane.b32.xlu2 %v906_v59, %s1375_s26 }
0x1072   :  { %v978_v45 = vmul.f32 %v976_v3, %v961_v34 }
0x1074   :  { %v979_v8 = vpack.c.bf16 %v978_v45, %v978_v45 }
0x1076   :  { %981 = vrot.lane.b32.xlu0 %v979_v8, %s1375_s26 }
0x10cb   :  { %v923_v50 = vpop.permute.xlu2 %922 }
0x10cc   :  { %1253 = vmatmul.msk.bf16.vlgmr.msrb.gmra.mxu3 %vm117_vm8, %v923_v50 }
0x10e8   :  { %v982_v60 = vpop.permute.xlu0 %981 }
0x10e9   :  { %1255 = vmatmul.msk.bf16.vlgmr.msrb.gmra.mxu0 %vm117_vm8, %v982_v60  ;;  %1257 = vmatmul.msk.bf16.vlgmr.msra.gmra.mxu1 %vm117_vm8, %v982_v60 }
0x114f   :  { %v936_v61 = vpop.f32.mrf.mxu3 }
0x1150   :  { %v937_v48 = vadd.f32 %v1741_v52, %v936_v61 }
0x1157   :  { %v938_v63 = vpop.f32.mrf.mxu3 }
0x1166   :  { %v995_v4 = vpop.f32.mrf.mxu0  ;;  %v1048_v56 = vpop.f32.mrf.mxu1 }
0x1167   :  { %v996_v57 = vadd.f32 %v995_v4, %v937_v48  ;;  %v1052_v5 = vadd.f32 %v1048_v56, %v88_v0 }
0x1169   :  { %v999_v2 = vmul.f32 %v996_v57, %v1438_v17  ;;  %v1072_v6 = vmul.f32 %v1052_v5, %v1438_v17 }
0x116b   :  { %v1256_v7 = vmul.f32 -1.442695, %v999_v2  ;;  %v1259_v12 = vmul.f32 -1.442695, %v1072_v6 }
0x116d   :  { %1351 = vpow2.f32 %v1256_v7 }
0x116e   :  { %1353 = vpow2.f32 %v1259_v12  ;;  %v997_v40 = vpop.f32.mrf.mxu0  ;;  %v1050_v1 = vpop.f32.mrf.mxu1 }
0x1173   :  { %v1352_v38 = vpop.eup %1351 }
0x1174   :  { %v1354_v9 = vpop.eup %1353  ;;  %v1003_v10 = vadd.f32 1.0, %v1352_v38 }
0x1175   :  { %v1076_v11 = vadd.f32 1.0, %v1354_v9 }
0x1176   :  { %1355 = vrcp.f32 %v1003_v10  ;;  %v1015_v62 = vand.u32 2147483648, %v1003_v10  ;;  %v1013_v22 = vand.u32 2147483647, %v1003_v10  ;;  %vm1009_vm15 = vweird.f32 %v1003_v10 }
0x1177   :  { %1357 = vrcp.f32 %v1076_v11  ;;  %v1088_v19 = vand.u32 2147483648, %v1076_v11  ;;  %v1086_v25 = vand.u32 2147483647, %v1076_v11  ;;  %vm1082_vm1 = vweird.f32 %v1076_v11 }
0x1178   :  { %v1016_v43 = vor.u32 1.1754944e-38, %v1015_v62  ;;  %vm1014_vm0 = vcmp.eq.f32.partialorder %v1013_v22, 8.507059e+37 }
0x1179   :  { %v1089_v27 = vor.u32 1.1754944e-38, %v1088_v19  ;;  %vm1087_vm4 = vcmp.eq.f32.partialorder %v1086_v25, 8.507059e+37  ;;  %v1170_v25 = vld [vmem:[%s1795_s1 + $0x80] sm:$0xff] }
0x117c   :  { %v1356_v14 = vpop.eup %1355 }
0x117d   :  { %v1358_v39 = vpop.eup %1357  ;;  %v1005_v58 = vmul.f32 %v1356_v14, %v1003_v10  ;;  %vm1010_vm13 = vweird.f32 %v1356_v14 }
0x117e   :  { %v1078_v15 = vmul.f32 %v1358_v39, %v1076_v11  ;;  %vm1083_vm14 = vweird.f32 %v1358_v39  ;;  %vm1011_vm2 = vmor %vm1009_vm15, %vm1010_vm13 }
0x117f   :  { %v1006_v16 = vsub.f32 1.0, %v1005_v58  ;;  %vm1084_vm3 = vmor %vm1082_vm1, %vm1083_vm14 }
0x1180   :  { %v1079_v18 = vsub.f32 1.0, %v1078_v15 }
0x1181   :  { %v1007_v21 = vmul.f32 %v1356_v14, %v1006_v16 }
0x1182   :  { %v1080_v23 = vmul.f32 %v1358_v39, %v1079_v18 }
0x1183   :  { %v1008_v13 = vadd.f32 %v1356_v14, %v1007_v21 }
0x1184   :  { %v1081_v26 = vadd.f32 %v1358_v39, %v1080_v23  ;;  %v1173_v23 = vld [vmem:[%s1795_s1 + $0x98] sm:$0xff] }
0x1185   :  { %v1012_v28 = vsel %vm1011_vm2, %v1356_v14, %v1008_v13  ;;  %1195 = vmatpush.msra.mxu0 %v1173_v23 }
0x1186   :  { %v1085_v29 = vsel %vm1084_vm3, %v1358_v39, %v1081_v26  ;;  %v1017_v30 = vsel %vm1014_vm0, %v1016_v43, %v1012_v28 }
0x1187   :  { %v1090_v31 = vsel %vm1087_vm4, %v1089_v27, %v1085_v29  ;;  %v1019_v32 = vmul.f32 %v1017_v30, %v1438_v17  ;;  %v1270_v27 = vld [vmem:[%s1795_s1 + $0xa0] ss:$0 sm:$0xff]  ;;  %v1271_v30 = vld [vmem:[%s1795_s1 + $0xa8] ss:$0 sm:$0xff] }
0x1188   :  { %v1092_v33 = vmul.f32 %v1090_v31, %v1438_v17 }
0x1189   :  { %v1020_v34 = vadd.f32 %v1019_v32, %v1443_v35 }
0x118a   :  { %v1093_v36 = vadd.f32 %v1092_v33, %v1443_v35  ;;  %v1272_v33 = vld [vmem:[%s1795_s1 + $0xb0] ss:$0 sm:$0xff] }
0x118b   :  { %1023 = vrot.lane.b32.xlu1 %v1020_v34, %s1374_s25  ;;  %v1021_v20 = vmul.f32 %v1020_v34, %v1722_v49 }
0x118c   :  { %1096 = vrot.lane.b32.xlu2 %v1093_v36, %s1374_s25  ;;  %v1094_v24 = vmul.f32 %v1093_v36, %v1726_v37 }
0x11e6   :  { %v1097_v41 = vpop.permute.xlu2 %1096 }
0x11e7   :  { %v1099_v42 = vmul.f32 %v1097_v41, %v1093_v36 }
0x11e9   :  { %1101 = vrot.lane.b32.xlu1 %v1099_v42, %s1375_s26 }
0x11fd   :  { %v1024_v44 = vpop.permute.xlu1 %1023 }
0x11fe   :  { %v1026_v47 = vmul.f32 %v1024_v44, %v1020_v34 }
0x1200   :  { %1028 = vrot.lane.b32.xlu0 %v1026_v47, %s1375_s26 }
0x125b   :  { %v1102_v51 = vpop.permute.xlu1 %1101 }
0x125c   :  { %v1104_v53 = vadd.f32 %v1102_v51, %v1094_v24 }
0x125e   :  { %1359 = vtanh.f32 %v1104_v53 }
0x1264   :  { %v1360_v54 = vpop.eup %1359 }
0x1265   :  { %1107 = vrot.lane.b32.xlu0 %v1360_v54, %s1374_s25 }
0x1272   :  { %v1029_v55 = vpop.permute.xlu0 %1028 }
0x1273   :  { %v1031_v46 = vadd.f32 %v1029_v55, %v1021_v20 }
0x1275   :  { %1361 = vtanh.f32 %v1031_v46 }
0x127b   :  { %v1362_v59 = vpop.eup %1361 }
0x127c   :  { %1034 = vrot.lane.b32.xlu2 %v1362_v59, %s1374_s25 }
0x12d6   :  { %v1035_v3 = vpop.permute.xlu2 %1034 }
0x12d7   :  { %v1108_v45 = vpop.permute.xlu0 %1107  ;;  %v1037_v8 = vmul.f32 %v1035_v3, %v1020_v34 }
0x12d8   :  { %v1110_v50 = vmul.f32 %v1108_v45, %v1093_v36 }
0x12d9   :  { %v1038_v60 = vpack.c.bf16 %v1037_v8, %v1037_v8 }
0x12da   :  { %v1111_v37 = vpack.c.bf16 %v1110_v50, %v1110_v50 }
0x12db   :  { %1054 = vrot.lane.b32.xlu1 %v1038_v60, %s1375_s26 }
0x12dc   :  { %1113 = vrot.lane.b32.xlu2 %v1111_v37, %s1375_s26 }
0x1336   :  { %v1114_v61 = vpop.permute.xlu2 %1113 }
0x1337   :  { %1260 = vmatmul.msk.bf16.vlgmr.msra.gmra.mxu3 %vm117_vm8, %v1114_v61 }
0x134d   :  { %v1055_v49 = vpop.permute.xlu1 %1054 }
0x134e   :  { %1258 = vmatmul.msk.bf16.vlgmr.msra.gmra.mxu2 %vm117_vm8, %v1055_v49 }
0x13ba   :  { %v1127_v63 = vpop.f32.mrf.mxu3 }
0x13c2   :  { %v1129_v0 = vpop.f32.mrf.mxu3 }
0x13d1   :  { %v1068_v48 = vpop.f32.mrf.mxu2 }
0x13d2   :  { %v1069_v4 = vadd.f32 %v1741_v52, %v1068_v48 }
0x13d4   :  { %v1128_v56 = vadd.f32 %v1127_v63, %v1069_v4 }
0x13d6   :  { %v1131_v57 = vmul.f32 %v1128_v56, %v1438_v17 }
0x13d8   :  { %v1261_v5 = vmul.f32 -1.442695, %v1131_v57 }
0x13d9   :  { %v1070_v2 = vpop.f32.mrf.mxu2 }
0x13da   :  { %1363 = vpow2.f32 %v1261_v5 }
0x13e0   :  { %v1364_v6 = vpop.eup %1363 }
0x13e1   :  { %v1135_v7 = vadd.f32 1.0, %v1364_v6 }
0x13e3   :  { %1365 = vrcp.f32 %v1135_v7  ;;  %v1147_v38 = vand.u32 2147483648, %v1135_v7  ;;  %v1145_v10 = vand.u32 2147483647, %v1135_v7  ;;  %vm1141_vm6 = vweird.f32 %v1135_v7 }
0x13e5   :  { %v1148_v52 = vor.u32 1.1754944e-38, %v1147_v38  ;;  %vm1146_vm9 = vcmp.eq.f32.partialorder %v1145_v10, 8.507059e+37 }
0x13e9   :  { %v1366_v12 = vpop.eup %1365 }
0x13ea   :  { %v1137_v40 = vmul.f32 %v1366_v12, %v1135_v7  ;;  %vm1142_vm5 = vweird.f32 %v1366_v12 }
0x13eb   :  { %vm1143_vm7 = vmor %vm1141_vm6, %vm1142_vm5 }
0x13ec   :  { %v1138_v1 = vsub.f32 1.0, %v1137_v40 }
0x13ee   :  { %v1139_v9 = vmul.f32 %v1366_v12, %v1138_v1 }
0x13f0   :  { %v1140_v11 = vadd.f32 %v1366_v12, %v1139_v9 }
0x13f2   :  { %v1144_v14 = vsel %vm1143_vm7, %v1366_v12, %v1140_v11 }
0x13f3   :  { %v1149_v39 = vsel %vm1146_vm9, %v1148_v52, %v1144_v14 }
0x13f4   :  { %v1151_v58 = vmul.f32 %v1149_v39, %v1438_v17  ;;  %v1172_v17 = vld [vmem:[%s1795_s1 + $0x90] sm:$0xff] }
0x13f5   :  { %1196 = vmatpush.msra.mxu0 %v1172_v17 }
0x13f6   :  { %v1152_v15 = vadd.f32 %v1151_v58, %v1443_v35  ;;  %v1171_v35 = vld [vmem:[%s1795_s1 + $0x88] sm:$0xff] }
0x13f7   :  { %1197 = vmatpush.msra.mxu0 %v1171_v35 }
0x13f8   :  { %1155 = vrot.lane.b32.xlu0 %v1152_v15, %s1374_s25  ;;  %v1153_v62 = vmul.f32 %v1152_v15, %v1031_v46 }
0x13f9   :  { %1198 = vmatpush.msra.mxu0 %v1170_v25 }
0x146a   :  { %v1156_v16 = vpop.permute.xlu0 %1155 }
0x146b   :  { %v1158_v18 = vmul.f32 %v1156_v16, %v1152_v15 }
0x146d   :  { %1160 = vrot.lane.b32.xlu1 %v1158_v18, %s1375_s26 }
0x14df   :  { %v1161_v19 = vpop.permute.xlu1 %1160 }
0x14e0   :  { %v1163_v21 = vadd.f32 %v1161_v19, %v1153_v62 }
0x14e2   :  { %1367 = vtanh.f32 %v1163_v21 }
0x14e8   :  { %v1368_v22 = vpop.eup %1367 }
0x14e9   :  { %1166 = vrot.lane.b32.xlu2 %v1368_v22, %s1374_s25 }
0x1543   :  { %v1167_v13 = vpop.permute.xlu2 %1166 }
0x1544   :  { %v1169_v26 = vmul.f32 %v1167_v13, %v1152_v15 }
0x1546   :  { %1179 = vrot.lane.b32.xlu0 %v1169_v26, %s1375_s26 }
0x15b8   :  { %v1180_v43 = vpop.permute.xlu0 %1179 }
0x15b9   :  { %1262 = vmatmul.msk.f32.vlgmr.msra.gmra.mxu0 %vm117_vm8, %v1180_v43 }
0x1636   :  { %v1200_v28 = vpop.f32.mrf.mxu0 }
0x1637   :  { %v1201_v29 = vadd.f32 %v1270_v27, %v1200_v28 }
0x1639   :  { %v1203_v31 = vmax.f32 %v1201_v29, 0.0 }
0x163b   :  { %v1205_v32 = vmul.f32 %v1271_v30, %v1203_v31 }
0x163d   :  { %1206 = vadd.xlane.f32.xlu1 %v1205_v32 }
0x16b0   :  { %v1207_v34 = vpop.xlane.xlu1 %1206 }
0x16b1   :  { %v1209_v36 = vadd.f32 %v1272_v33, %v1207_v34 }
0x16b3   :  { %1211 = vst.msk [vmem:[%s1797_s2] sm:$0xff] %vm1210_vm10, %v1209_v36 }

</bundles_post_ra>
